<compile_context>
chip_gen: v6e
topology: v6e:2x2x1
jax: 0.10.0
libtpu: 0.0.40
codegen_flags: <defaults>
</compile_context>

<pallas_src>
import functools

import jax
import jax.numpy as jnp
from jax.experimental import pallas as pl
from jax.experimental.pallas import tpu as pltpu


def _fused_lstm_kernel(x_ref, wih0_ref, wih_rest_ref, whh_ref, b_ref,
                       h0_ref, c0_ref, wfc_ref, bfc_ref, out_ref,
                       seq_sc, gates_sc, *, T, B, H, L):
    """Whole LSTM stack + FC in one kernel invocation.

    x_ref:         (T*B, 1)             time-major input, batch padded
    wih0_ref:      (1, 4H)              layer-0 W_ih^T (input size 1)
    wih_rest_ref:  (max(L-1,1), H, 4H)  W_ih^T of layers 1..L-1 (dummy if L == 1)
    whh_ref:       (L, H, 4H)           W_hh^T
    b_ref:         (L, 1, 4H)           b_ih + b_hh
    h0_ref, c0_ref:(L, B, H)
    wfc_ref:       (H, O),  bfc_ref: (1, O)
    out_ref:       (B, O)
    seq_sc:        (T*B, H)  VMEM       current layer's output sequence
    gates_sc:      (T*B, 4H) VMEM       hoisted input-projection gates
    """
    h_last = None
    for l in range(L):                           # L is a static Python int
        # ---- hoisted, non-recurrent input projection for the whole sequence ----
        if l == 0:
            # F_in == 1: (T*B,1) @ (1,4H) is an outer product -> VPU broadcast-mul.
            gates_sc[...] = x_ref[...] * wih0_ref[...] + b_ref[0]
        else:
            gates_sc[...] = (
                jnp.dot(seq_sc[...], wih_rest_ref[l - 1],
                        preferred_element_type=jnp.float32)
                + b_ref[l])

        w_hh = whh_ref[l]                        # (H, 4H), loaded once per layer
        write_seq = l < L - 1                    # last layer only needs final h

        def step(t, carry, w_hh=w_hh, write_seq=write_seq):
            h, c = carry
            base = pl.multiple_of(t * B, B)      # B is a multiple of 8 -> aligned
            g = (gates_sc[pl.ds(base, B), :]
                 + jnp.dot(h, w_hh, preferred_element_type=jnp.float32))
            i_g = jax.nn.sigmoid(g[:, 0 * H:1 * H])
            f_g = jax.nn.sigmoid(g[:, 1 * H:2 * H])
            g_g = jnp.tanh(g[:, 2 * H:3 * H])
            o_g = jax.nn.sigmoid(g[:, 3 * H:4 * H])
            c_new = f_g * c + i_g * g_g
            h_new = o_g * jnp.tanh(c_new)
            if write_seq:                        # static python bool
                seq_sc[pl.ds(base, B), :] = h_new
            return h_new, c_new

        h_last, _ = jax.lax.fori_loop(0, T, step, (h0_ref[l], c0_ref[l]),
                                      unroll=True)

    # fc(out)[:, -1, :] == fc applied to the last hidden state of the last layer.
    out_ref[...] = (jnp.dot(h_last, wfc_ref[...],
                            preferred_element_type=jnp.float32)
                    + bfc_ref[...])


def _round_up(x, m):
    return (x + m - 1) // m * m


@functools.partial(jax.jit, static_argnames=("hidden_dim", "output_dim", "layer_num"))
def lstm_forward(x, params, h0, c0, *, hidden_dim, output_dim, layer_num):
    """x: (B, T) float32.  Mirrors PyTorch: x.unsqueeze(2) -> LSTM -> fc -> out[:, -1, :]."""
    B, T = x.shape
    H, O, L = hidden_dim, output_dim, layer_num
    Bp = max(8, _round_up(B, 8))                 # pad batch to full f32 sublanes

    # time-major, batch-padded, flattened to a (T*Bp, 1) column so the layer-0
    # input projection is a broadcast multiply inside the kernel.
    x_tm = jnp.transpose(x.astype(jnp.float32))                  # (T, B)
    x_tm = jnp.pad(x_tm, ((0, 0), (0, Bp - B)))
    x_col = x_tm.reshape(T * Bp, 1)

    h0_p = jnp.pad(h0.astype(jnp.float32), ((0, 0), (0, Bp - B), (0, 0)))
    c0_p = jnp.pad(c0.astype(jnp.float32), ((0, 0), (0, Bp - B), (0, 0)))

    wih_rest = params["w_ih_rest"]
    n_rest = wih_rest.shape[0]

    kernel = functools.partial(_fused_lstm_kernel, T=T, B=Bp, H=H, L=L)

    grid_spec = pltpu.PrefetchScalarGridSpec(
        num_scalar_prefetch=0,
        grid=(1,),                               # single step: loops live in-kernel
        in_specs=[
            pl.BlockSpec((T * Bp, 1), lambda i: (0, 0)),          # x column
            pl.BlockSpec((1, 4 * H), lambda i: (0, 0)),           # layer-0 W_ih^T
            pl.BlockSpec((n_rest, H, 4 * H), lambda i: (0, 0, 0)),# W_ih^T layers 1..
            pl.BlockSpec((L, H, 4 * H), lambda i: (0, 0, 0)),     # W_hh^T
            pl.BlockSpec((L, 1, 4 * H), lambda i: (0, 0, 0)),     # bias
            pl.BlockSpec((L, Bp, H), lambda i: (0, 0, 0)),        # h0
            pl.BlockSpec((L, Bp, H), lambda i: (0, 0, 0)),        # c0
            pl.BlockSpec((H, O), lambda i: (0, 0)),               # W_fc^T
            pl.BlockSpec((1, O), lambda i: (0, 0)),               # b_fc
        ],
        out_specs=pl.BlockSpec((Bp, O), lambda i: (0, 0)),
        scratch_shapes=[
            pltpu.VMEM((T * Bp, H), jnp.float32),        # inter-layer sequence
            pltpu.VMEM((T * Bp, 4 * H), jnp.float32),    # hoisted gates
        ],
    )

    out = pl.pallas_call(
        kernel,
        out_shape=jax.ShapeDtypeStruct((Bp, O), jnp.float32),
        grid_spec=grid_spec,
        compiler_params=pltpu.CompilerParams(
            dimension_semantics=("arbitrary",)),
    )(x_col, params["w_ih0_row"], wih_rest, params["w_hh_t"], params["bias"],
      h0_p, c0_p, params["w_fc_t"], params["b_fc"])

    return out[:B]


def init_params(key, hidden_dim, output_dim, layer_num):
    """Deterministic synthetic init, PyTorch-style uniform(-1/sqrt(H), 1/sqrt(H))."""
    H, O, L = hidden_dim, output_dim, layer_num
    bound = 1.0 / jnp.sqrt(jnp.float32(H))
    w_ih0_row = None
    w_ih_rest, w_hh_t, bias = [], [], []
    for l in range(L):
        in_dim = 1 if l == 0 else H
        key, k1, k2, k3, k4 = jax.random.split(key, 5)
        w_ih = jax.random.uniform(k1, (4 * H, in_dim), jnp.float32, -bound, bound)
        w_hh = jax.random.uniform(k2, (4 * H, H), jnp.float32, -bound, bound)
        b_ih = jax.random.uniform(k3, (4 * H,), jnp.float32, -bound, bound)
        b_hh = jax.random.uniform(k4, (4 * H,), jnp.float32, -bound, bound)
        if l == 0:
            w_ih0_row = jnp.transpose(w_ih)                 # (1, 4H)
        else:
            w_ih_rest.append(jnp.transpose(w_ih))           # (H, 4H)
        w_hh_t.append(jnp.transpose(w_hh))                  # (H, 4H)
        bias.append((b_ih + b_hh).reshape(1, 4 * H))        # (1, 4H)
    if w_ih_rest:
        w_ih_rest = jnp.stack(w_ih_rest)                    # (L-1, H, 4H)
    else:
        w_ih_rest = jnp.zeros((1, H, 4 * H), jnp.float32)   # dummy, unused if L == 1
    key, k5, k6 = jax.random.split(key, 3)
    w_fc = jax.random.uniform(k5, (O, H), jnp.float32, -bound, bound)
    b_fc = jax.random.uniform(k6, (O,), jnp.float32, -bound, bound)
    params = dict(
        w_ih0_row=w_ih0_row,
        w_ih_rest=w_ih_rest,
        w_hh_t=jnp.stack(w_hh_t),                           # (L, H, 4H)
        bias=jnp.stack(bias),                               # (L, 1, 4H)
        w_fc_t=jnp.transpose(w_fc),                         # (H, O)
        b_fc=b_fc.reshape(1, O),                            # (1, O)
    )
    return params, key


def lstm_reference(x, params, h0, c0, hidden_dim, layer_num):
    """Pure-JAX (XLA) reference used for a correctness check."""
    H = hidden_dim
    seq = x[:, :, None].astype(jnp.float32)                 # (B, T, 1)
    for l in range(layer_num):
        w_ih_t = params["w_ih0_row"] if l == 0 else params["w_ih_rest"][l - 1]
        w_hh_t = params["w_hh_t"][l]
        b = params["bias"][l]

        def step(carry, x_t, w_ih_t=w_ih_t, w_hh_t=w_hh_t, b=b):
            h, c = carry
            g = x_t @ w_ih_t + h @ w_hh_t + b
            i = jax.nn.sigmoid(g[:, :H])
            f = jax.nn.sigmoid(g[:, H:2 * H])
            gg = jnp.tanh(g[:, 2 * H:3 * H])
            o = jax.nn.sigmoid(g[:, 3 * H:])
            c = f * c + i * gg
            h = o * jnp.tanh(c)
            return (h, c), h

        xs = jnp.swapaxes(seq, 0, 1)                        # (T, B, F)
        _, hs = jax.lax.scan(step, (h0[l], c0[l]), xs)
        seq = jnp.swapaxes(hs, 0, 1)                        # (B, T, H)
    last = seq[:, -1, :]
    return last @ params["w_fc_t"] + params["b_fc"]


if __name__ == "__main__":
    hidden_dim, output_dim, layer_num = 32, 4, 2
    B, T = 2, 8

    key = jax.random.PRNGKey(0)
    params, key = init_params(key, hidden_dim, output_dim, layer_num)

    key, kx, kh, kc = jax.random.split(key, 4)
    x = jax.random.normal(kx, (B, T), jnp.float32)
    # PyTorch forward draws h0/c0 from randn each call; generated deterministically here.
    h0 = jax.random.normal(kh, (layer_num, B, hidden_dim), jnp.float32)
    c0 = jax.random.normal(kc, (layer_num, B, hidden_dim), jnp.float32)

    out = lstm_forward(x, params, h0, c0, hidden_dim=hidden_dim,
                       output_dim=output_dim, layer_num=layer_num)
    jax.block_until_ready(out)
    assert out.shape == (B, output_dim)

    ref = lstm_reference(x, params, h0, c0, hidden_dim, layer_num)
    assert jnp.allclose(out, ref, atol=1e-3, rtol=1e-3)

    print("KERNEL_OK")
</pallas_src>

<mosaic_0001>
module attributes {stable_mosaic.version = 11 : i64} {
  func.func @_fused_lstm_kernel(%arg0: i32, %arg1: memref<64x1xf32, #tpu.memory_space<vmem>>, %arg2: memref<1x128xf32, #tpu.memory_space<vmem>>, %arg3: memref<1x32x128xf32, #tpu.memory_space<vmem>>, %arg4: memref<2x32x128xf32, #tpu.memory_space<vmem>>, %arg5: memref<2x1x128xf32, #tpu.memory_space<vmem>>, %arg6: memref<2x8x32xf32, #tpu.memory_space<vmem>>, %arg7: memref<2x8x32xf32, #tpu.memory_space<vmem>>, %arg8: memref<32x4xf32, #tpu.memory_space<vmem>>, %arg9: memref<1x4xf32, #tpu.memory_space<vmem>>, %arg10: memref<8x4xf32, #tpu.memory_space<vmem>>, %arg11: memref<64x32xf32, #tpu.memory_space<vmem>>, %arg12: memref<64x128xf32, #tpu.memory_space<vmem>>) attributes {dimension_semantics = [#tpu.dimension_semantics<arbitrary>], iteration_bounds = array<i64: 1>, scalar_prefetch = 0 : i64, scratch_operands = 2 : i64, tpu.core_type = #tpu.core_type<tc>, window_params = [{pipeline_mode = #tpu.pipeline_mode<synchronous>, transform_indices = @transform_0, window_bounds = array<i64: 64, 1>}, {pipeline_mode = #tpu.pipeline_mode<synchronous>, transform_indices = @transform_1, window_bounds = array<i64: 1, 128>}, {pipeline_mode = #tpu.pipeline_mode<synchronous>, transform_indices = @transform_2, window_bounds = array<i64: 1, 32, 128>}, {pipeline_mode = #tpu.pipeline_mode<synchronous>, transform_indices = @transform_3, window_bounds = array<i64: 2, 32, 128>}, {pipeline_mode = #tpu.pipeline_mode<synchronous>, transform_indices = @transform_4, window_bounds = array<i64: 2, 1, 128>}, {pipeline_mode = #tpu.pipeline_mode<synchronous>, transform_indices = @transform_5, window_bounds = array<i64: 2, 8, 32>}, {pipeline_mode = #tpu.pipeline_mode<synchronous>, transform_indices = @transform_6, window_bounds = array<i64: 2, 8, 32>}, {pipeline_mode = #tpu.pipeline_mode<synchronous>, transform_indices = @transform_7, window_bounds = array<i64: 32, 4>}, {pipeline_mode = #tpu.pipeline_mode<synchronous>, transform_indices = @transform_8, window_bounds = array<i64: 1, 4>}, {pipeline_mode = #tpu.pipeline_mode<synchronous>, transform_indices = @transform_9, window_bounds = array<i64: 8, 4>}]} {
    %c0 = arith.constant 0 : index
    %c0_0 = arith.constant 0 : index
    %0 = vector.load %arg1[%c0, %c0_0] : memref<64x1xf32, #tpu.memory_space<vmem>>, vector<64x1xf32>
    %c0_1 = arith.constant 0 : index
    %c0_2 = arith.constant 0 : index
    %1 = vector.load %arg2[%c0_1, %c0_2] : memref<1x128xf32, #tpu.memory_space<vmem>>, vector<1x128xf32>
    %2 = vector.broadcast %0 : vector<64x1xf32> to vector<64x128xf32>
    %3 = vector.broadcast %1 : vector<1x128xf32> to vector<64x128xf32>
    %4 = arith.mulf %2, %3 : vector<64x128xf32>
    %c0_3 = arith.constant 0 : index
    %c0_4 = arith.constant 0 : index
    %c0_5 = arith.constant 0 : index
    %5 = vector.load %arg5[%c0_3, %c0_4, %c0_5] : memref<2x1x128xf32, #tpu.memory_space<vmem>>, vector<1x1x128xf32>
    %6 = vector.shape_cast %5 : vector<1x1x128xf32> to vector<1x128xf32>
    %7 = vector.broadcast %6 : vector<1x128xf32> to vector<64x128xf32>
    %8 = arith.addf %4, %7 : vector<64x128xf32>
    %c0_6 = arith.constant 0 : index
    %c0_7 = arith.constant 0 : index
    %9 = vector.load %arg12[%c0_6, %c0_7] : memref<64x128xf32, #tpu.memory_space<vmem>>, vector<64x128xf32>
    tpu.vector_store %arg12[%c0_6, %c0_7], %8 {strides = array<i32>} : memref<64x128xf32, #tpu.memory_space<vmem>>, vector<64x128xf32>,
    %c0_8 = arith.constant 0 : index
    %c0_9 = arith.constant 0 : index
    %c0_10 = arith.constant 0 : index
    %10 = vector.load %arg4[%c0_8, %c0_9, %c0_10] : memref<2x32x128xf32, #tpu.memory_space<vmem>>, vector<1x32x128xf32>
    %11 = vector.shape_cast %10 : vector<1x32x128xf32> to vector<32x128xf32>
    %c0_11 = arith.constant 0 : index
    %c0_12 = arith.constant 0 : index
    %c0_13 = arith.constant 0 : index
    %12 = vector.load %arg6[%c0_11, %c0_12, %c0_13] : memref<2x8x32xf32, #tpu.memory_space<vmem>>, vector<1x8x32xf32>
    %13 = vector.shape_cast %12 : vector<1x8x32xf32> to vector<8x32xf32>
    %c0_14 = arith.constant 0 : index
    %c0_15 = arith.constant 0 : index
    %c0_16 = arith.constant 0 : index
    %14 = vector.load %arg7[%c0_14, %c0_15, %c0_16] : memref<2x8x32xf32, #tpu.memory_space<vmem>>, vector<1x8x32xf32>
    %15 = vector.shape_cast %14 : vector<1x8x32xf32> to vector<8x32xf32>
    %c0_i32 = arith.constant 0 : i32
    %c8_i32 = arith.constant 8 : i32
    %16 = arith.muli %c0_i32, %c8_i32 : i32
    %17 = tpu.assume_multiple %16, 8 : i32
    %18 = arith.index_cast %17 : i32 to index
    %c0_17 = arith.constant 0 : index
    %19 = vector.load %arg12[%18, %c0_17] : memref<64x128xf32, #tpu.memory_space<vmem>>, vector<8x128xf32>
    %cst = arith.constant dense<0.000000e+00> : vector<8x128xf32>
    %20 = tpu.matmul %13, %11, %cst {dimension_numbers = #tpu.dot_dimension_numbers<[1], [0], [0], [1], [0, 0, 1, 1], [], []>} : vector<8x32xf32>, vector<32x128xf32>, vector<8x128xf32> -> vector<8x128xf32>
    %21 = arith.addf %19, %20 : vector<8x128xf32>
    %22 = vector.extract_strided_slice %21 {offsets = [0, 0], sizes = [8, 32], strides = [1, 1]} : vector<8x128xf32> to vector<8x32xf32>
    %23 = arith.negf %22 : vector<8x32xf32>
    %24 = math.exp %23 : vector<8x32xf32>
    %cst_18 = arith.constant 1.000000e+00 : f32
    %25 = vector.broadcast %cst_18 : f32 to vector<8x32xf32>
    %26 = arith.addf %25, %24 : vector<8x32xf32>
    %27 = arith.divf %25, %26 : vector<8x32xf32>
    %28 = vector.extract_strided_slice %21 {offsets = [0, 32], sizes = [8, 32], strides = [1, 1]} : vector<8x128xf32> to vector<8x32xf32>
    %29 = arith.negf %28 : vector<8x32xf32>
    %30 = math.exp %29 : vector<8x32xf32>
    %cst_19 = arith.constant 1.000000e+00 : f32
    %31 = vector.broadcast %cst_19 : f32 to vector<8x32xf32>
    %32 = arith.addf %31, %30 : vector<8x32xf32>
    %33 = arith.divf %31, %32 : vector<8x32xf32>
    %34 = vector.extract_strided_slice %21 {offsets = [0, 64], sizes = [8, 32], strides = [1, 1]} : vector<8x128xf32> to vector<8x32xf32>
    %35 = math.tanh %34 : vector<8x32xf32>
    %36 = vector.extract_strided_slice %21 {offsets = [0, 96], sizes = [8, 32], strides = [1, 1]} : vector<8x128xf32> to vector<8x32xf32>
    %37 = arith.negf %36 : vector<8x32xf32>
    %38 = math.exp %37 : vector<8x32xf32>
    %cst_20 = arith.constant 1.000000e+00 : f32
    %39 = vector.broadcast %cst_20 : f32 to vector<8x32xf32>
    %40 = arith.addf %39, %38 : vector<8x32xf32>
    %41 = arith.divf %39, %40 : vector<8x32xf32>
    %42 = arith.mulf %33, %15 : vector<8x32xf32>
    %43 = arith.mulf %27, %35 : vector<8x32xf32>
    %44 = arith.addf %42, %43 : vector<8x32xf32>
    %45 = math.tanh %44 : vector<8x32xf32>
    %46 = arith.mulf %41, %45 : vector<8x32xf32>
    %47 = arith.index_cast %17 : i32 to index
    %c0_21 = arith.constant 0 : index
    %48 = vector.load %arg11[%47, %c0_21] : memref<64x32xf32, #tpu.memory_space<vmem>>, vector<8x32xf32>
    tpu.vector_store %arg11[%47, %c0_21], %46 {strides = array<i32>} : memref<64x32xf32, #tpu.memory_space<vmem>>, vector<8x32xf32>,
    %c1_i32 = arith.constant 1 : i32
    %c8_i32_22 = arith.constant 8 : i32
    %49 = arith.muli %c1_i32, %c8_i32_22 : i32
    %50 = tpu.assume_multiple %49, 8 : i32
    %51 = arith.index_cast %50 : i32 to index
    %c0_23 = arith.constant 0 : index
    %52 = vector.load %arg12[%51, %c0_23] : memref<64x128xf32, #tpu.memory_space<vmem>>, vector<8x128xf32>
    %cst_24 = arith.constant dense<0.000000e+00> : vector<8x128xf32>
    %53 = tpu.matmul %46, %11, %cst_24 {dimension_numbers = #tpu.dot_dimension_numbers<[1], [0], [0], [1], [0, 0, 1, 1], [], []>} : vector<8x32xf32>, vector<32x128xf32>, vector<8x128xf32> -> vector<8x128xf32>
    %54 = arith.addf %52, %53 : vector<8x128xf32>
    %55 = vector.extract_strided_slice %54 {offsets = [0, 0], sizes = [8, 32], strides = [1, 1]} : vector<8x128xf32> to vector<8x32xf32>
    %56 = arith.negf %55 : vector<8x32xf32>
    %57 = math.exp %56 : vector<8x32xf32>
    %cst_25 = arith.constant 1.000000e+00 : f32
    %58 = vector.broadcast %cst_25 : f32 to vector<8x32xf32>
    %59 = arith.addf %58, %57 : vector<8x32xf32>
    %60 = arith.divf %58, %59 : vector<8x32xf32>
    %61 = vector.extract_strided_slice %54 {offsets = [0, 32], sizes = [8, 32], strides = [1, 1]} : vector<8x128xf32> to vector<8x32xf32>
    %62 = arith.negf %61 : vector<8x32xf32>
    %63 = math.exp %62 : vector<8x32xf32>
    %cst_26 = arith.constant 1.000000e+00 : f32
    %64 = vector.broadcast %cst_26 : f32 to vector<8x32xf32>
    %65 = arith.addf %64, %63 : vector<8x32xf32>
    %66 = arith.divf %64, %65 : vector<8x32xf32>
    %67 = vector.extract_strided_slice %54 {offsets = [0, 64], sizes = [8, 32], strides = [1, 1]} : vector<8x128xf32> to vector<8x32xf32>
    %68 = math.tanh %67 : vector<8x32xf32>
    %69 = vector.extract_strided_slice %54 {offsets = [0, 96], sizes = [8, 32], strides = [1, 1]} : vector<8x128xf32> to vector<8x32xf32>
    %70 = arith.negf %69 : vector<8x32xf32>
    %71 = math.exp %70 : vector<8x32xf32>
    %cst_27 = arith.constant 1.000000e+00 : f32
    %72 = vector.broadcast %cst_27 : f32 to vector<8x32xf32>
    %73 = arith.addf %72, %71 : vector<8x32xf32>
    %74 = arith.divf %72, %73 : vector<8x32xf32>
    %75 = arith.mulf %66, %44 : vector<8x32xf32>
    %76 = arith.mulf %60, %68 : vector<8x32xf32>
    %77 = arith.addf %75, %76 : vector<8x32xf32>
    %78 = math.tanh %77 : vector<8x32xf32>
    %79 = arith.mulf %74, %78 : vector<8x32xf32>
    %80 = arith.index_cast %50 : i32 to index
    %c0_28 = arith.constant 0 : index
    %81 = vector.load %arg11[%80, %c0_28] : memref<64x32xf32, #tpu.memory_space<vmem>>, vector<8x32xf32>
    tpu.vector_store %arg11[%80, %c0_28], %79 {strides = array<i32>} : memref<64x32xf32, #tpu.memory_space<vmem>>, vector<8x32xf32>,
    %c2_i32 = arith.constant 2 : i32
    %c8_i32_29 = arith.constant 8 : i32
    %82 = arith.muli %c2_i32, %c8_i32_29 : i32
    %83 = tpu.assume_multiple %82, 8 : i32
    %84 = arith.index_cast %83 : i32 to index
    %c0_30 = arith.constant 0 : index
    %85 = vector.load %arg12[%84, %c0_30] : memref<64x128xf32, #tpu.memory_space<vmem>>, vector<8x128xf32>
    %cst_31 = arith.constant dense<0.000000e+00> : vector<8x128xf32>
    %86 = tpu.matmul %79, %11, %cst_31 {dimension_numbers = #tpu.dot_dimension_numbers<[1], [0], [0], [1], [0, 0, 1, 1], [], []>} : vector<8x32xf32>, vector<32x128xf32>, vector<8x128xf32> -> vector<8x128xf32>
    %87 = arith.addf %85, %86 : vector<8x128xf32>
    %88 = vector.extract_strided_slice %87 {offsets = [0, 0], sizes = [8, 32], strides = [1, 1]} : vector<8x128xf32> to vector<8x32xf32>
    %89 = arith.negf %88 : vector<8x32xf32>
    %90 = math.exp %89 : vector<8x32xf32>
    %cst_32 = arith.constant 1.000000e+00 : f32
    %91 = vector.broadcast %cst_32 : f32 to vector<8x32xf32>
    %92 = arith.addf %91, %90 : vector<8x32xf32>
    %93 = arith.divf %91, %92 : vector<8x32xf32>
    %94 = vector.extract_strided_slice %87 {offsets = [0, 32], sizes = [8, 32], strides = [1, 1]} : vector<8x128xf32> to vector<8x32xf32>
    %95 = arith.negf %94 : vector<8x32xf32>
    %96 = math.exp %95 : vector<8x32xf32>
    %cst_33 = arith.constant 1.000000e+00 : f32
    %97 = vector.broadcast %cst_33 : f32 to vector<8x32xf32>
    %98 = arith.addf %97, %96 : vector<8x32xf32>
    %99 = arith.divf %97, %98 : vector<8x32xf32>
    %100 = vector.extract_strided_slice %87 {offsets = [0, 64], sizes = [8, 32], strides = [1, 1]} : vector<8x128xf32> to vector<8x32xf32>
    %101 = math.tanh %100 : vector<8x32xf32>
    %102 = vector.extract_strided_slice %87 {offsets = [0, 96], sizes = [8, 32], strides = [1, 1]} : vector<8x128xf32> to vector<8x32xf32>
    %103 = arith.negf %102 : vector<8x32xf32>
    %104 = math.exp %103 : vector<8x32xf32>
    %cst_34 = arith.constant 1.000000e+00 : f32
    %105 = vector.broadcast %cst_34 : f32 to vector<8x32xf32>
    %106 = arith.addf %105, %104 : vector<8x32xf32>
    %107 = arith.divf %105, %106 : vector<8x32xf32>
    %108 = arith.mulf %99, %77 : vector<8x32xf32>
    %109 = arith.mulf %93, %101 : vector<8x32xf32>
    %110 = arith.addf %108, %109 : vector<8x32xf32>
    %111 = math.tanh %110 : vector<8x32xf32>
    %112 = arith.mulf %107, %111 : vector<8x32xf32>
    %113 = arith.index_cast %83 : i32 to index
    %c0_35 = arith.constant 0 : index
    %114 = vector.load %arg11[%113, %c0_35] : memref<64x32xf32, #tpu.memory_space<vmem>>, vector<8x32xf32>
    tpu.vector_store %arg11[%113, %c0_35], %112 {strides = array<i32>} : memref<64x32xf32, #tpu.memory_space<vmem>>, vector<8x32xf32>,
    %c3_i32 = arith.constant 3 : i32
    %c8_i32_36 = arith.constant 8 : i32
    %115 = arith.muli %c3_i32, %c8_i32_36 : i32
    %116 = tpu.assume_multiple %115, 8 : i32
    %117 = arith.index_cast %116 : i32 to index
    %c0_37 = arith.constant 0 : index
    %118 = vector.load %arg12[%117, %c0_37] : memref<64x128xf32, #tpu.memory_space<vmem>>, vector<8x128xf32>
    %cst_38 = arith.constant dense<0.000000e+00> : vector<8x128xf32>
    %119 = tpu.matmul %112, %11, %cst_38 {dimension_numbers = #tpu.dot_dimension_numbers<[1], [0], [0], [1], [0, 0, 1, 1], [], []>} : vector<8x32xf32>, vector<32x128xf32>, vector<8x128xf32> -> vector<8x128xf32>
    %120 = arith.addf %118, %119 : vector<8x128xf32>
    %121 = vector.extract_strided_slice %120 {offsets = [0, 0], sizes = [8, 32], strides = [1, 1]} : vector<8x128xf32> to vector<8x32xf32>
    %122 = arith.negf %121 : vector<8x32xf32>
    %123 = math.exp %122 : vector<8x32xf32>
    %cst_39 = arith.constant 1.000000e+00 : f32
    %124 = vector.broadcast %cst_39 : f32 to vector<8x32xf32>
    %125 = arith.addf %124, %123 : vector<8x32xf32>
    %126 = arith.divf %124, %125 : vector<8x32xf32>
    %127 = vector.extract_strided_slice %120 {offsets = [0, 32], sizes = [8, 32], strides = [1, 1]} : vector<8x128xf32> to vector<8x32xf32>
    %128 = arith.negf %127 : vector<8x32xf32>
    %129 = math.exp %128 : vector<8x32xf32>
    %cst_40 = arith.constant 1.000000e+00 : f32
    %130 = vector.broadcast %cst_40 : f32 to vector<8x32xf32>
    %131 = arith.addf %130, %129 : vector<8x32xf32>
    %132 = arith.divf %130, %131 : vector<8x32xf32>
    %133 = vector.extract_strided_slice %120 {offsets = [0, 64], sizes = [8, 32], strides = [1, 1]} : vector<8x128xf32> to vector<8x32xf32>
    %134 = math.tanh %133 : vector<8x32xf32>
    %135 = vector.extract_strided_slice %120 {offsets = [0, 96], sizes = [8, 32], strides = [1, 1]} : vector<8x128xf32> to vector<8x32xf32>
    %136 = arith.negf %135 : vector<8x32xf32>
    %137 = math.exp %136 : vector<8x32xf32>
    %cst_41 = arith.constant 1.000000e+00 : f32
    %138 = vector.broadcast %cst_41 : f32 to vector<8x32xf32>
    %139 = arith.addf %138, %137 : vector<8x32xf32>
    %140 = arith.divf %138, %139 : vector<8x32xf32>
    %141 = arith.mulf %132, %110 : vector<8x32xf32>
    %142 = arith.mulf %126, %134 : vector<8x32xf32>
    %143 = arith.addf %141, %142 : vector<8x32xf32>
    %144 = math.tanh %143 : vector<8x32xf32>
    %145 = arith.mulf %140, %144 : vector<8x32xf32>
    %146 = arith.index_cast %116 : i32 to index
    %c0_42 = arith.constant 0 : index
    %147 = vector.load %arg11[%146, %c0_42] : memref<64x32xf32, #tpu.memory_space<vmem>>, vector<8x32xf32>
    tpu.vector_store %arg11[%146, %c0_42], %145 {strides = array<i32>} : memref<64x32xf32, #tpu.memory_space<vmem>>, vector<8x32xf32>,
    %c4_i32 = arith.constant 4 : i32
    %c8_i32_43 = arith.constant 8 : i32
    %148 = arith.muli %c4_i32, %c8_i32_43 : i32
    %149 = tpu.assume_multiple %148, 8 : i32
    %150 = arith.index_cast %149 : i32 to index
    %c0_44 = arith.constant 0 : index
    %151 = vector.load %arg12[%150, %c0_44] : memref<64x128xf32, #tpu.memory_space<vmem>>, vector<8x128xf32>
    %cst_45 = arith.constant dense<0.000000e+00> : vector<8x128xf32>
    %152 = tpu.matmul %145, %11, %cst_45 {dimension_numbers = #tpu.dot_dimension_numbers<[1], [0], [0], [1], [0, 0, 1, 1], [], []>} : vector<8x32xf32>, vector<32x128xf32>, vector<8x128xf32> -> vector<8x128xf32>
    %153 = arith.addf %151, %152 : vector<8x128xf32>
    %154 = vector.extract_strided_slice %153 {offsets = [0, 0], sizes = [8, 32], strides = [1, 1]} : vector<8x128xf32> to vector<8x32xf32>
    %155 = arith.negf %154 : vector<8x32xf32>
    %156 = math.exp %155 : vector<8x32xf32>
    %cst_46 = arith.constant 1.000000e+00 : f32
    %157 = vector.broadcast %cst_46 : f32 to vector<8x32xf32>
    %158 = arith.addf %157, %156 : vector<8x32xf32>
    %159 = arith.divf %157, %158 : vector<8x32xf32>
    %160 = vector.extract_strided_slice %153 {offsets = [0, 32], sizes = [8, 32], strides = [1, 1]} : vector<8x128xf32> to vector<8x32xf32>
    %161 = arith.negf %160 : vector<8x32xf32>
    %162 = math.exp %161 : vector<8x32xf32>
    %cst_47 = arith.constant 1.000000e+00 : f32
    %163 = vector.broadcast %cst_47 : f32 to vector<8x32xf32>
    %164 = arith.addf %163, %162 : vector<8x32xf32>
    %165 = arith.divf %163, %164 : vector<8x32xf32>
    %166 = vector.extract_strided_slice %153 {offsets = [0, 64], sizes = [8, 32], strides = [1, 1]} : vector<8x128xf32> to vector<8x32xf32>
    %167 = math.tanh %166 : vector<8x32xf32>
    %168 = vector.extract_strided_slice %153 {offsets = [0, 96], sizes = [8, 32], strides = [1, 1]} : vector<8x128xf32> to vector<8x32xf32>
    %169 = arith.negf %168 : vector<8x32xf32>
    %170 = math.exp %169 : vector<8x32xf32>
    %cst_48 = arith.constant 1.000000e+00 : f32
    %171 = vector.broadcast %cst_48 : f32 to vector<8x32xf32>
    %172 = arith.addf %171, %170 : vector<8x32xf32>
    %173 = arith.divf %171, %172 : vector<8x32xf32>
    %174 = arith.mulf %165, %143 : vector<8x32xf32>
    %175 = arith.mulf %159, %167 : vector<8x32xf32>
    %176 = arith.addf %174, %175 : vector<8x32xf32>
    %177 = math.tanh %176 : vector<8x32xf32>
    %178 = arith.mulf %173, %177 : vector<8x32xf32>
    %179 = arith.index_cast %149 : i32 to index
    %c0_49 = arith.constant 0 : index
    %180 = vector.load %arg11[%179, %c0_49] : memref<64x32xf32, #tpu.memory_space<vmem>>, vector<8x32xf32>
    tpu.vector_store %arg11[%179, %c0_49], %178 {strides = array<i32>} : memref<64x32xf32, #tpu.memory_space<vmem>>, vector<8x32xf32>,
    %c5_i32 = arith.constant 5 : i32
    %c8_i32_50 = arith.constant 8 : i32
    %181 = arith.muli %c5_i32, %c8_i32_50 : i32
    %182 = tpu.assume_multiple %181, 8 : i32
    %183 = arith.index_cast %182 : i32 to index
    %c0_51 = arith.constant 0 : index
    %184 = vector.load %arg12[%183, %c0_51] : memref<64x128xf32, #tpu.memory_space<vmem>>, vector<8x128xf32>
    %cst_52 = arith.constant dense<0.000000e+00> : vector<8x128xf32>
    %185 = tpu.matmul %178, %11, %cst_52 {dimension_numbers = #tpu.dot_dimension_numbers<[1], [0], [0], [1], [0, 0, 1, 1], [], []>} : vector<8x32xf32>, vector<32x128xf32>, vector<8x128xf32> -> vector<8x128xf32>
    %186 = arith.addf %184, %185 : vector<8x128xf32>
    %187 = vector.extract_strided_slice %186 {offsets = [0, 0], sizes = [8, 32], strides = [1, 1]} : vector<8x128xf32> to vector<8x32xf32>
    %188 = arith.negf %187 : vector<8x32xf32>
    %189 = math.exp %188 : vector<8x32xf32>
    %cst_53 = arith.constant 1.000000e+00 : f32
    %190 = vector.broadcast %cst_53 : f32 to vector<8x32xf32>
    %191 = arith.addf %190, %189 : vector<8x32xf32>
    %192 = arith.divf %190, %191 : vector<8x32xf32>
    %193 = vector.extract_strided_slice %186 {offsets = [0, 32], sizes = [8, 32], strides = [1, 1]} : vector<8x128xf32> to vector<8x32xf32>
    %194 = arith.negf %193 : vector<8x32xf32>
    %195 = math.exp %194 : vector<8x32xf32>
    %cst_54 = arith.constant 1.000000e+00 : f32
    %196 = vector.broadcast %cst_54 : f32 to vector<8x32xf32>
    %197 = arith.addf %196, %195 : vector<8x32xf32>
    %198 = arith.divf %196, %197 : vector<8x32xf32>
    %199 = vector.extract_strided_slice %186 {offsets = [0, 64], sizes = [8, 32], strides = [1, 1]} : vector<8x128xf32> to vector<8x32xf32>
    %200 = math.tanh %199 : vector<8x32xf32>
    %201 = vector.extract_strided_slice %186 {offsets = [0, 96], sizes = [8, 32], strides = [1, 1]} : vector<8x128xf32> to vector<8x32xf32>
    %202 = arith.negf %201 : vector<8x32xf32>
    %203 = math.exp %202 : vector<8x32xf32>
    %cst_55 = arith.constant 1.000000e+00 : f32
    %204 = vector.broadcast %cst_55 : f32 to vector<8x32xf32>
    %205 = arith.addf %204, %203 : vector<8x32xf32>
    %206 = arith.divf %204, %205 : vector<8x32xf32>
    %207 = arith.mulf %198, %176 : vector<8x32xf32>
    %208 = arith.mulf %192, %200 : vector<8x32xf32>
    %209 = arith.addf %207, %208 : vector<8x32xf32>
    %210 = math.tanh %209 : vector<8x32xf32>
    %211 = arith.mulf %206, %210 : vector<8x32xf32>
    %212 = arith.index_cast %182 : i32 to index
    %c0_56 = arith.constant 0 : index
    %213 = vector.load %arg11[%212, %c0_56] : memref<64x32xf32, #tpu.memory_space<vmem>>, vector<8x32xf32>
    tpu.vector_store %arg11[%212, %c0_56], %211 {strides = array<i32>} : memref<64x32xf32, #tpu.memory_space<vmem>>, vector<8x32xf32>,
    %c6_i32 = arith.constant 6 : i32
    %c8_i32_57 = arith.constant 8 : i32
    %214 = arith.muli %c6_i32, %c8_i32_57 : i32
    %215 = tpu.assume_multiple %214, 8 : i32
    %216 = arith.index_cast %215 : i32 to index
    %c0_58 = arith.constant 0 : index
    %217 = vector.load %arg12[%216, %c0_58] : memref<64x128xf32, #tpu.memory_space<vmem>>, vector<8x128xf32>
    %cst_59 = arith.constant dense<0.000000e+00> : vector<8x128xf32>
    %218 = tpu.matmul %211, %11, %cst_59 {dimension_numbers = #tpu.dot_dimension_numbers<[1], [0], [0], [1], [0, 0, 1, 1], [], []>} : vector<8x32xf32>, vector<32x128xf32>, vector<8x128xf32> -> vector<8x128xf32>
    %219 = arith.addf %217, %218 : vector<8x128xf32>
    %220 = vector.extract_strided_slice %219 {offsets = [0, 0], sizes = [8, 32], strides = [1, 1]} : vector<8x128xf32> to vector<8x32xf32>
    %221 = arith.negf %220 : vector<8x32xf32>
    %222 = math.exp %221 : vector<8x32xf32>
    %cst_60 = arith.constant 1.000000e+00 : f32
    %223 = vector.broadcast %cst_60 : f32 to vector<8x32xf32>
    %224 = arith.addf %223, %222 : vector<8x32xf32>
    %225 = arith.divf %223, %224 : vector<8x32xf32>
    %226 = vector.extract_strided_slice %219 {offsets = [0, 32], sizes = [8, 32], strides = [1, 1]} : vector<8x128xf32> to vector<8x32xf32>
    %227 = arith.negf %226 : vector<8x32xf32>
    %228 = math.exp %227 : vector<8x32xf32>
    %cst_61 = arith.constant 1.000000e+00 : f32
    %229 = vector.broadcast %cst_61 : f32 to vector<8x32xf32>
    %230 = arith.addf %229, %228 : vector<8x32xf32>
    %231 = arith.divf %229, %230 : vector<8x32xf32>
    %232 = vector.extract_strided_slice %219 {offsets = [0, 64], sizes = [8, 32], strides = [1, 1]} : vector<8x128xf32> to vector<8x32xf32>
    %233 = math.tanh %232 : vector<8x32xf32>
    %234 = vector.extract_strided_slice %219 {offsets = [0, 96], sizes = [8, 32], strides = [1, 1]} : vector<8x128xf32> to vector<8x32xf32>
    %235 = arith.negf %234 : vector<8x32xf32>
    %236 = math.exp %235 : vector<8x32xf32>
    %cst_62 = arith.constant 1.000000e+00 : f32
    %237 = vector.broadcast %cst_62 : f32 to vector<8x32xf32>
    %238 = arith.addf %237, %236 : vector<8x32xf32>
    %239 = arith.divf %237, %238 : vector<8x32xf32>
    %240 = arith.mulf %231, %209 : vector<8x32xf32>
    %241 = arith.mulf %225, %233 : vector<8x32xf32>
    %242 = arith.addf %240, %241 : vector<8x32xf32>
    %243 = math.tanh %242 : vector<8x32xf32>
    %244 = arith.mulf %239, %243 : vector<8x32xf32>
    %245 = arith.index_cast %215 : i32 to index
    %c0_63 = arith.constant 0 : index
    %246 = vector.load %arg11[%245, %c0_63] : memref<64x32xf32, #tpu.memory_space<vmem>>, vector<8x32xf32>
    tpu.vector_store %arg11[%245, %c0_63], %244 {strides = array<i32>} : memref<64x32xf32, #tpu.memory_space<vmem>>, vector<8x32xf32>,
    %c7_i32 = arith.constant 7 : i32
    %c8_i32_64 = arith.constant 8 : i32
    %247 = arith.muli %c7_i32, %c8_i32_64 : i32
    %248 = tpu.assume_multiple %247, 8 : i32
    %249 = arith.index_cast %248 : i32 to index
    %c0_65 = arith.constant 0 : index
    %250 = vector.load %arg12[%249, %c0_65] : memref<64x128xf32, #tpu.memory_space<vmem>>, vector<8x128xf32>
    %cst_66 = arith.constant dense<0.000000e+00> : vector<8x128xf32>
    %251 = tpu.matmul %244, %11, %cst_66 {dimension_numbers = #tpu.dot_dimension_numbers<[1], [0], [0], [1], [0, 0, 1, 1], [], []>} : vector<8x32xf32>, vector<32x128xf32>, vector<8x128xf32> -> vector<8x128xf32>
    %252 = arith.addf %250, %251 : vector<8x128xf32>
    %253 = vector.extract_strided_slice %252 {offsets = [0, 0], sizes = [8, 32], strides = [1, 1]} : vector<8x128xf32> to vector<8x32xf32>
    %254 = arith.negf %253 : vector<8x32xf32>
    %255 = math.exp %254 : vector<8x32xf32>
    %cst_67 = arith.constant 1.000000e+00 : f32
    %256 = vector.broadcast %cst_67 : f32 to vector<8x32xf32>
    %257 = arith.addf %256, %255 : vector<8x32xf32>
    %258 = arith.divf %256, %257 : vector<8x32xf32>
    %259 = vector.extract_strided_slice %252 {offsets = [0, 32], sizes = [8, 32], strides = [1, 1]} : vector<8x128xf32> to vector<8x32xf32>
    %260 = arith.negf %259 : vector<8x32xf32>
    %261 = math.exp %260 : vector<8x32xf32>
    %cst_68 = arith.constant 1.000000e+00 : f32
    %262 = vector.broadcast %cst_68 : f32 to vector<8x32xf32>
    %263 = arith.addf %262, %261 : vector<8x32xf32>
    %264 = arith.divf %262, %263 : vector<8x32xf32>
    %265 = vector.extract_strided_slice %252 {offsets = [0, 64], sizes = [8, 32], strides = [1, 1]} : vector<8x128xf32> to vector<8x32xf32>
    %266 = math.tanh %265 : vector<8x32xf32>
    %267 = vector.extract_strided_slice %252 {offsets = [0, 96], sizes = [8, 32], strides = [1, 1]} : vector<8x128xf32> to vector<8x32xf32>
    %268 = arith.negf %267 : vector<8x32xf32>
    %269 = math.exp %268 : vector<8x32xf32>
    %cst_69 = arith.constant 1.000000e+00 : f32
    %270 = vector.broadcast %cst_69 : f32 to vector<8x32xf32>
    %271 = arith.addf %270, %269 : vector<8x32xf32>
    %272 = arith.divf %270, %271 : vector<8x32xf32>
    %273 = arith.mulf %264, %242 : vector<8x32xf32>
    %274 = arith.mulf %258, %266 : vector<8x32xf32>
    %275 = arith.addf %273, %274 : vector<8x32xf32>
    %276 = math.tanh %275 : vector<8x32xf32>
    %277 = arith.mulf %272, %276 : vector<8x32xf32>
    %278 = arith.index_cast %248 : i32 to index
    %c0_70 = arith.constant 0 : index
    %279 = vector.load %arg11[%278, %c0_70] : memref<64x32xf32, #tpu.memory_space<vmem>>, vector<8x32xf32>
    tpu.vector_store %arg11[%278, %c0_70], %277 {strides = array<i32>} : memref<64x32xf32, #tpu.memory_space<vmem>>, vector<8x32xf32>,
    %c8_i32_71 = arith.constant 8 : i32
    %c0_72 = arith.constant 0 : index
    %c0_73 = arith.constant 0 : index
    %280 = vector.load %arg11[%c0_72, %c0_73] : memref<64x32xf32, #tpu.memory_space<vmem>>, vector<64x32xf32>
    %c0_74 = arith.constant 0 : index
    %c0_75 = arith.constant 0 : index
    %c0_76 = arith.constant 0 : index
    %281 = vector.load %arg3[%c0_74, %c0_75, %c0_76] : memref<1x32x128xf32, #tpu.memory_space<vmem>>, vector<1x32x128xf32>
    %282 = vector.shape_cast %281 : vector<1x32x128xf32> to vector<32x128xf32>
    %cst_77 = arith.constant dense<0.000000e+00> : vector<64x128xf32>
    %283 = tpu.matmul %280, %282, %cst_77 {dimension_numbers = #tpu.dot_dimension_numbers<[1], [0], [0], [1], [0, 0, 1, 1], [], []>} : vector<64x32xf32>, vector<32x128xf32>, vector<64x128xf32> -> vector<64x128xf32>
    %c1 = arith.constant 1 : index
    %c0_78 = arith.constant 0 : index
    %c0_79 = arith.constant 0 : index
    %284 = vector.load %arg5[%c1, %c0_78, %c0_79] : memref<2x1x128xf32, #tpu.memory_space<vmem>>, vector<1x1x128xf32>
    %285 = vector.shape_cast %284 : vector<1x1x128xf32> to vector<1x128xf32>
    %286 = vector.broadcast %285 : vector<1x128xf32> to vector<64x128xf32>
    %287 = arith.addf %283, %286 : vector<64x128xf32>
    %c0_80 = arith.constant 0 : index
    %c0_81 = arith.constant 0 : index
    %288 = vector.load %arg12[%c0_80, %c0_81] : memref<64x128xf32, #tpu.memory_space<vmem>>, vector<64x128xf32>
    tpu.vector_store %arg12[%c0_80, %c0_81], %287 {strides = array<i32>} : memref<64x128xf32, #tpu.memory_space<vmem>>, vector<64x128xf32>,
    %c1_82 = arith.constant 1 : index
    %c0_83 = arith.constant 0 : index
    %c0_84 = arith.constant 0 : index
    %289 = vector.load %arg4[%c1_82, %c0_83, %c0_84] : memref<2x32x128xf32, #tpu.memory_space<vmem>>, vector<1x32x128xf32>
    %290 = vector.shape_cast %289 : vector<1x32x128xf32> to vector<32x128xf32>
    %c1_85 = arith.constant 1 : index
    %c0_86 = arith.constant 0 : index
    %c0_87 = arith.constant 0 : index
    %291 = vector.load %arg6[%c1_85, %c0_86, %c0_87] : memref<2x8x32xf32, #tpu.memory_space<vmem>>, vector<1x8x32xf32>
    %292 = vector.shape_cast %291 : vector<1x8x32xf32> to vector<8x32xf32>
    %c1_88 = arith.constant 1 : index
    %c0_89 = arith.constant 0 : index
    %c0_90 = arith.constant 0 : index
    %293 = vector.load %arg7[%c1_88, %c0_89, %c0_90] : memref<2x8x32xf32, #tpu.memory_space<vmem>>, vector<1x8x32xf32>
    %294 = vector.shape_cast %293 : vector<1x8x32xf32> to vector<8x32xf32>
    %c0_i32_91 = arith.constant 0 : i32
    %c8_i32_92 = arith.constant 8 : i32
    %295 = arith.muli %c0_i32_91, %c8_i32_92 : i32
    %296 = tpu.assume_multiple %295, 8 : i32
    %297 = arith.index_cast %296 : i32 to index
    %c0_93 = arith.constant 0 : index
    %298 = vector.load %arg12[%297, %c0_93] : memref<64x128xf32, #tpu.memory_space<vmem>>, vector<8x128xf32>
    %cst_94 = arith.constant dense<0.000000e+00> : vector<8x128xf32>
    %299 = tpu.matmul %292, %290, %cst_94 {dimension_numbers = #tpu.dot_dimension_numbers<[1], [0], [0], [1], [0, 0, 1, 1], [], []>} : vector<8x32xf32>, vector<32x128xf32>, vector<8x128xf32> -> vector<8x128xf32>
    %300 = arith.addf %298, %299 : vector<8x128xf32>
    %301 = vector.extract_strided_slice %300 {offsets = [0, 0], sizes = [8, 32], strides = [1, 1]} : vector<8x128xf32> to vector<8x32xf32>
    %302 = arith.negf %301 : vector<8x32xf32>
    %303 = math.exp %302 : vector<8x32xf32>
    %cst_95 = arith.constant 1.000000e+00 : f32
    %304 = vector.broadcast %cst_95 : f32 to vector<8x32xf32>
    %305 = arith.addf %304, %303 : vector<8x32xf32>
    %306 = arith.divf %304, %305 : vector<8x32xf32>
    %307 = vector.extract_strided_slice %300 {offsets = [0, 32], sizes = [8, 32], strides = [1, 1]} : vector<8x128xf32> to vector<8x32xf32>
    %308 = arith.negf %307 : vector<8x32xf32>
    %309 = math.exp %308 : vector<8x32xf32>
    %cst_96 = arith.constant 1.000000e+00 : f32
    %310 = vector.broadcast %cst_96 : f32 to vector<8x32xf32>
    %311 = arith.addf %310, %309 : vector<8x32xf32>
    %312 = arith.divf %310, %311 : vector<8x32xf32>
    %313 = vector.extract_strided_slice %300 {offsets = [0, 64], sizes = [8, 32], strides = [1, 1]} : vector<8x128xf32> to vector<8x32xf32>
    %314 = math.tanh %313 : vector<8x32xf32>
    %315 = vector.extract_strided_slice %300 {offsets = [0, 96], sizes = [8, 32], strides = [1, 1]} : vector<8x128xf32> to vector<8x32xf32>
    %316 = arith.negf %315 : vector<8x32xf32>
    %317 = math.exp %316 : vector<8x32xf32>
    %cst_97 = arith.constant 1.000000e+00 : f32
    %318 = vector.broadcast %cst_97 : f32 to vector<8x32xf32>
    %319 = arith.addf %318, %317 : vector<8x32xf32>
    %320 = arith.divf %318, %319 : vector<8x32xf32>
    %321 = arith.mulf %312, %294 : vector<8x32xf32>
    %322 = arith.mulf %306, %314 : vector<8x32xf32>
    %323 = arith.addf %321, %322 : vector<8x32xf32>
    %324 = math.tanh %323 : vector<8x32xf32>
    %325 = arith.mulf %320, %324 : vector<8x32xf32>
    %c1_i32_98 = arith.constant 1 : i32
    %c8_i32_99 = arith.constant 8 : i32
    %326 = arith.muli %c1_i32_98, %c8_i32_99 : i32
    %327 = tpu.assume_multiple %326, 8 : i32
    %328 = arith.index_cast %327 : i32 to index
    %c0_100 = arith.constant 0 : index
    %329 = vector.load %arg12[%328, %c0_100] : memref<64x128xf32, #tpu.memory_space<vmem>>, vector<8x128xf32>
    %cst_101 = arith.constant dense<0.000000e+00> : vector<8x128xf32>
    %330 = tpu.matmul %325, %290, %cst_101 {dimension_numbers = #tpu.dot_dimension_numbers<[1], [0], [0], [1], [0, 0, 1, 1], [], []>} : vector<8x32xf32>, vector<32x128xf32>, vector<8x128xf32> -> vector<8x128xf32>
    %331 = arith.addf %329, %330 : vector<8x128xf32>
    %332 = vector.extract_strided_slice %331 {offsets = [0, 0], sizes = [8, 32], strides = [1, 1]} : vector<8x128xf32> to vector<8x32xf32>
    %333 = arith.negf %332 : vector<8x32xf32>
    %334 = math.exp %333 : vector<8x32xf32>
    %cst_102 = arith.constant 1.000000e+00 : f32
    %335 = vector.broadcast %cst_102 : f32 to vector<8x32xf32>
    %336 = arith.addf %335, %334 : vector<8x32xf32>
    %337 = arith.divf %335, %336 : vector<8x32xf32>
    %338 = vector.extract_strided_slice %331 {offsets = [0, 32], sizes = [8, 32], strides = [1, 1]} : vector<8x128xf32> to vector<8x32xf32>
    %339 = arith.negf %338 : vector<8x32xf32>
    %340 = math.exp %339 : vector<8x32xf32>
    %cst_103 = arith.constant 1.000000e+00 : f32
    %341 = vector.broadcast %cst_103 : f32 to vector<8x32xf32>
    %342 = arith.addf %341, %340 : vector<8x32xf32>
    %343 = arith.divf %341, %342 : vector<8x32xf32>
    %344 = vector.extract_strided_slice %331 {offsets = [0, 64], sizes = [8, 32], strides = [1, 1]} : vector<8x128xf32> to vector<8x32xf32>
    %345 = math.tanh %344 : vector<8x32xf32>
    %346 = vector.extract_strided_slice %331 {offsets = [0, 96], sizes = [8, 32], strides = [1, 1]} : vector<8x128xf32> to vector<8x32xf32>
    %347 = arith.negf %346 : vector<8x32xf32>
    %348 = math.exp %347 : vector<8x32xf32>
    %cst_104 = arith.constant 1.000000e+00 : f32
    %349 = vector.broadcast %cst_104 : f32 to vector<8x32xf32>
    %350 = arith.addf %349, %348 : vector<8x32xf32>
    %351 = arith.divf %349, %350 : vector<8x32xf32>
    %352 = arith.mulf %343, %323 : vector<8x32xf32>
    %353 = arith.mulf %337, %345 : vector<8x32xf32>
    %354 = arith.addf %352, %353 : vector<8x32xf32>
    %355 = math.tanh %354 : vector<8x32xf32>
    %356 = arith.mulf %351, %355 : vector<8x32xf32>
    %c2_i32_105 = arith.constant 2 : i32
    %c8_i32_106 = arith.constant 8 : i32
    %357 = arith.muli %c2_i32_105, %c8_i32_106 : i32
    %358 = tpu.assume_multiple %357, 8 : i32
    %359 = arith.index_cast %358 : i32 to index
    %c0_107 = arith.constant 0 : index
    %360 = vector.load %arg12[%359, %c0_107] : memref<64x128xf32, #tpu.memory_space<vmem>>, vector<8x128xf32>
    %cst_108 = arith.constant dense<0.000000e+00> : vector<8x128xf32>
    %361 = tpu.matmul %356, %290, %cst_108 {dimension_numbers = #tpu.dot_dimension_numbers<[1], [0], [0], [1], [0, 0, 1, 1], [], []>} : vector<8x32xf32>, vector<32x128xf32>, vector<8x128xf32> -> vector<8x128xf32>
    %362 = arith.addf %360, %361 : vector<8x128xf32>
    %363 = vector.extract_strided_slice %362 {offsets = [0, 0], sizes = [8, 32], strides = [1, 1]} : vector<8x128xf32> to vector<8x32xf32>
    %364 = arith.negf %363 : vector<8x32xf32>
    %365 = math.exp %364 : vector<8x32xf32>
    %cst_109 = arith.constant 1.000000e+00 : f32
    %366 = vector.broadcast %cst_109 : f32 to vector<8x32xf32>
    %367 = arith.addf %366, %365 : vector<8x32xf32>
    %368 = arith.divf %366, %367 : vector<8x32xf32>
    %369 = vector.extract_strided_slice %362 {offsets = [0, 32], sizes = [8, 32], strides = [1, 1]} : vector<8x128xf32> to vector<8x32xf32>
    %370 = arith.negf %369 : vector<8x32xf32>
    %371 = math.exp %370 : vector<8x32xf32>
    %cst_110 = arith.constant 1.000000e+00 : f32
    %372 = vector.broadcast %cst_110 : f32 to vector<8x32xf32>
    %373 = arith.addf %372, %371 : vector<8x32xf32>
    %374 = arith.divf %372, %373 : vector<8x32xf32>
    %375 = vector.extract_strided_slice %362 {offsets = [0, 64], sizes = [8, 32], strides = [1, 1]} : vector<8x128xf32> to vector<8x32xf32>
    %376 = math.tanh %375 : vector<8x32xf32>
    %377 = vector.extract_strided_slice %362 {offsets = [0, 96], sizes = [8, 32], strides = [1, 1]} : vector<8x128xf32> to vector<8x32xf32>
    %378 = arith.negf %377 : vector<8x32xf32>
    %379 = math.exp %378 : vector<8x32xf32>
    %cst_111 = arith.constant 1.000000e+00 : f32
    %380 = vector.broadcast %cst_111 : f32 to vector<8x32xf32>
    %381 = arith.addf %380, %379 : vector<8x32xf32>
    %382 = arith.divf %380, %381 : vector<8x32xf32>
    %383 = arith.mulf %374, %354 : vector<8x32xf32>
    %384 = arith.mulf %368, %376 : vector<8x32xf32>
    %385 = arith.addf %383, %384 : vector<8x32xf32>
    %386 = math.tanh %385 : vector<8x32xf32>
    %387 = arith.mulf %382, %386 : vector<8x32xf32>
    %c3_i32_112 = arith.constant 3 : i32
    %c8_i32_113 = arith.constant 8 : i32
    %388 = arith.muli %c3_i32_112, %c8_i32_113 : i32
    %389 = tpu.assume_multiple %388, 8 : i32
    %390 = arith.index_cast %389 : i32 to index
    %c0_114 = arith.constant 0 : index
    %391 = vector.load %arg12[%390, %c0_114] : memref<64x128xf32, #tpu.memory_space<vmem>>, vector<8x128xf32>
    %cst_115 = arith.constant dense<0.000000e+00> : vector<8x128xf32>
    %392 = tpu.matmul %387, %290, %cst_115 {dimension_numbers = #tpu.dot_dimension_numbers<[1], [0], [0], [1], [0, 0, 1, 1], [], []>} : vector<8x32xf32>, vector<32x128xf32>, vector<8x128xf32> -> vector<8x128xf32>
    %393 = arith.addf %391, %392 : vector<8x128xf32>
    %394 = vector.extract_strided_slice %393 {offsets = [0, 0], sizes = [8, 32], strides = [1, 1]} : vector<8x128xf32> to vector<8x32xf32>
    %395 = arith.negf %394 : vector<8x32xf32>
    %396 = math.exp %395 : vector<8x32xf32>
    %cst_116 = arith.constant 1.000000e+00 : f32
    %397 = vector.broadcast %cst_116 : f32 to vector<8x32xf32>
    %398 = arith.addf %397, %396 : vector<8x32xf32>
    %399 = arith.divf %397, %398 : vector<8x32xf32>
    %400 = vector.extract_strided_slice %393 {offsets = [0, 32], sizes = [8, 32], strides = [1, 1]} : vector<8x128xf32> to vector<8x32xf32>
    %401 = arith.negf %400 : vector<8x32xf32>
    %402 = math.exp %401 : vector<8x32xf32>
    %cst_117 = arith.constant 1.000000e+00 : f32
    %403 = vector.broadcast %cst_117 : f32 to vector<8x32xf32>
    %404 = arith.addf %403, %402 : vector<8x32xf32>
    %405 = arith.divf %403, %404 : vector<8x32xf32>
    %406 = vector.extract_strided_slice %393 {offsets = [0, 64], sizes = [8, 32], strides = [1, 1]} : vector<8x128xf32> to vector<8x32xf32>
    %407 = math.tanh %406 : vector<8x32xf32>
    %408 = vector.extract_strided_slice %393 {offsets = [0, 96], sizes = [8, 32], strides = [1, 1]} : vector<8x128xf32> to vector<8x32xf32>
    %409 = arith.negf %408 : vector<8x32xf32>
    %410 = math.exp %409 : vector<8x32xf32>
    %cst_118 = arith.constant 1.000000e+00 : f32
    %411 = vector.broadcast %cst_118 : f32 to vector<8x32xf32>
    %412 = arith.addf %411, %410 : vector<8x32xf32>
    %413 = arith.divf %411, %412 : vector<8x32xf32>
    %414 = arith.mulf %405, %385 : vector<8x32xf32>
    %415 = arith.mulf %399, %407 : vector<8x32xf32>
    %416 = arith.addf %414, %415 : vector<8x32xf32>
    %417 = math.tanh %416 : vector<8x32xf32>
    %418 = arith.mulf %413, %417 : vector<8x32xf32>
    %c4_i32_119 = arith.constant 4 : i32
    %c8_i32_120 = arith.constant 8 : i32
    %419 = arith.muli %c4_i32_119, %c8_i32_120 : i32
    %420 = tpu.assume_multiple %419, 8 : i32
    %421 = arith.index_cast %420 : i32 to index
    %c0_121 = arith.constant 0 : index
    %422 = vector.load %arg12[%421, %c0_121] : memref<64x128xf32, #tpu.memory_space<vmem>>, vector<8x128xf32>
    %cst_122 = arith.constant dense<0.000000e+00> : vector<8x128xf32>
    %423 = tpu.matmul %418, %290, %cst_122 {dimension_numbers = #tpu.dot_dimension_numbers<[1], [0], [0], [1], [0, 0, 1, 1], [], []>} : vector<8x32xf32>, vector<32x128xf32>, vector<8x128xf32> -> vector<8x128xf32>
    %424 = arith.addf %422, %423 : vector<8x128xf32>
    %425 = vector.extract_strided_slice %424 {offsets = [0, 0], sizes = [8, 32], strides = [1, 1]} : vector<8x128xf32> to vector<8x32xf32>
    %426 = arith.negf %425 : vector<8x32xf32>
    %427 = math.exp %426 : vector<8x32xf32>
    %cst_123 = arith.constant 1.000000e+00 : f32
    %428 = vector.broadcast %cst_123 : f32 to vector<8x32xf32>
    %429 = arith.addf %428, %427 : vector<8x32xf32>
    %430 = arith.divf %428, %429 : vector<8x32xf32>
    %431 = vector.extract_strided_slice %424 {offsets = [0, 32], sizes = [8, 32], strides = [1, 1]} : vector<8x128xf32> to vector<8x32xf32>
    %432 = arith.negf %431 : vector<8x32xf32>
    %433 = math.exp %432 : vector<8x32xf32>
    %cst_124 = arith.constant 1.000000e+00 : f32
    %434 = vector.broadcast %cst_124 : f32 to vector<8x32xf32>
    %435 = arith.addf %434, %433 : vector<8x32xf32>
    %436 = arith.divf %434, %435 : vector<8x32xf32>
    %437 = vector.extract_strided_slice %424 {offsets = [0, 64], sizes = [8, 32], strides = [1, 1]} : vector<8x128xf32> to vector<8x32xf32>
    %438 = math.tanh %437 : vector<8x32xf32>
    %439 = vector.extract_strided_slice %424 {offsets = [0, 96], sizes = [8, 32], strides = [1, 1]} : vector<8x128xf32> to vector<8x32xf32>
    %440 = arith.negf %439 : vector<8x32xf32>
    %441 = math.exp %440 : vector<8x32xf32>
    %cst_125 = arith.constant 1.000000e+00 : f32
    %442 = vector.broadcast %cst_125 : f32 to vector<8x32xf32>
    %443 = arith.addf %442, %441 : vector<8x32xf32>
    %444 = arith.divf %442, %443 : vector<8x32xf32>
    %445 = arith.mulf %436, %416 : vector<8x32xf32>
    %446 = arith.mulf %430, %438 : vector<8x32xf32>
    %447 = arith.addf %445, %446 : vector<8x32xf32>
    %448 = math.tanh %447 : vector<8x32xf32>
    %449 = arith.mulf %444, %448 : vector<8x32xf32>
    %c5_i32_126 = arith.constant 5 : i32
    %c8_i32_127 = arith.constant 8 : i32
    %450 = arith.muli %c5_i32_126, %c8_i32_127 : i32
    %451 = tpu.assume_multiple %450, 8 : i32
    %452 = arith.index_cast %451 : i32 to index
    %c0_128 = arith.constant 0 : index
    %453 = vector.load %arg12[%452, %c0_128] : memref<64x128xf32, #tpu.memory_space<vmem>>, vector<8x128xf32>
    %cst_129 = arith.constant dense<0.000000e+00> : vector<8x128xf32>
    %454 = tpu.matmul %449, %290, %cst_129 {dimension_numbers = #tpu.dot_dimension_numbers<[1], [0], [0], [1], [0, 0, 1, 1], [], []>} : vector<8x32xf32>, vector<32x128xf32>, vector<8x128xf32> -> vector<8x128xf32>
    %455 = arith.addf %453, %454 : vector<8x128xf32>
    %456 = vector.extract_strided_slice %455 {offsets = [0, 0], sizes = [8, 32], strides = [1, 1]} : vector<8x128xf32> to vector<8x32xf32>
    %457 = arith.negf %456 : vector<8x32xf32>
    %458 = math.exp %457 : vector<8x32xf32>
    %cst_130 = arith.constant 1.000000e+00 : f32
    %459 = vector.broadcast %cst_130 : f32 to vector<8x32xf32>
    %460 = arith.addf %459, %458 : vector<8x32xf32>
    %461 = arith.divf %459, %460 : vector<8x32xf32>
    %462 = vector.extract_strided_slice %455 {offsets = [0, 32], sizes = [8, 32], strides = [1, 1]} : vector<8x128xf32> to vector<8x32xf32>
    %463 = arith.negf %462 : vector<8x32xf32>
    %464 = math.exp %463 : vector<8x32xf32>
    %cst_131 = arith.constant 1.000000e+00 : f32
    %465 = vector.broadcast %cst_131 : f32 to vector<8x32xf32>
    %466 = arith.addf %465, %464 : vector<8x32xf32>
    %467 = arith.divf %465, %466 : vector<8x32xf32>
    %468 = vector.extract_strided_slice %455 {offsets = [0, 64], sizes = [8, 32], strides = [1, 1]} : vector<8x128xf32> to vector<8x32xf32>
    %469 = math.tanh %468 : vector<8x32xf32>
    %470 = vector.extract_strided_slice %455 {offsets = [0, 96], sizes = [8, 32], strides = [1, 1]} : vector<8x128xf32> to vector<8x32xf32>
    %471 = arith.negf %470 : vector<8x32xf32>
    %472 = math.exp %471 : vector<8x32xf32>
    %cst_132 = arith.constant 1.000000e+00 : f32
    %473 = vector.broadcast %cst_132 : f32 to vector<8x32xf32>
    %474 = arith.addf %473, %472 : vector<8x32xf32>
    %475 = arith.divf %473, %474 : vector<8x32xf32>
    %476 = arith.mulf %467, %447 : vector<8x32xf32>
    %477 = arith.mulf %461, %469 : vector<8x32xf32>
    %478 = arith.addf %476, %477 : vector<8x32xf32>
    %479 = math.tanh %478 : vector<8x32xf32>
    %480 = arith.mulf %475, %479 : vector<8x32xf32>
    %c6_i32_133 = arith.constant 6 : i32
    %c8_i32_134 = arith.constant 8 : i32
    %481 = arith.muli %c6_i32_133, %c8_i32_134 : i32
    %482 = tpu.assume_multiple %481, 8 : i32
    %483 = arith.index_cast %482 : i32 to index
    %c0_135 = arith.constant 0 : index
    %484 = vector.load %arg12[%483, %c0_135] : memref<64x128xf32, #tpu.memory_space<vmem>>, vector<8x128xf32>
    %cst_136 = arith.constant dense<0.000000e+00> : vector<8x128xf32>
    %485 = tpu.matmul %480, %290, %cst_136 {dimension_numbers = #tpu.dot_dimension_numbers<[1], [0], [0], [1], [0, 0, 1, 1], [], []>} : vector<8x32xf32>, vector<32x128xf32>, vector<8x128xf32> -> vector<8x128xf32>
    %486 = arith.addf %484, %485 : vector<8x128xf32>
    %487 = vector.extract_strided_slice %486 {offsets = [0, 0], sizes = [8, 32], strides = [1, 1]} : vector<8x128xf32> to vector<8x32xf32>
    %488 = arith.negf %487 : vector<8x32xf32>
    %489 = math.exp %488 : vector<8x32xf32>
    %cst_137 = arith.constant 1.000000e+00 : f32
    %490 = vector.broadcast %cst_137 : f32 to vector<8x32xf32>
    %491 = arith.addf %490, %489 : vector<8x32xf32>
    %492 = arith.divf %490, %491 : vector<8x32xf32>
    %493 = vector.extract_strided_slice %486 {offsets = [0, 32], sizes = [8, 32], strides = [1, 1]} : vector<8x128xf32> to vector<8x32xf32>
    %494 = arith.negf %493 : vector<8x32xf32>
    %495 = math.exp %494 : vector<8x32xf32>
    %cst_138 = arith.constant 1.000000e+00 : f32
    %496 = vector.broadcast %cst_138 : f32 to vector<8x32xf32>
    %497 = arith.addf %496, %495 : vector<8x32xf32>
    %498 = arith.divf %496, %497 : vector<8x32xf32>
    %499 = vector.extract_strided_slice %486 {offsets = [0, 64], sizes = [8, 32], strides = [1, 1]} : vector<8x128xf32> to vector<8x32xf32>
    %500 = math.tanh %499 : vector<8x32xf32>
    %501 = vector.extract_strided_slice %486 {offsets = [0, 96], sizes = [8, 32], strides = [1, 1]} : vector<8x128xf32> to vector<8x32xf32>
    %502 = arith.negf %501 : vector<8x32xf32>
    %503 = math.exp %502 : vector<8x32xf32>
    %cst_139 = arith.constant 1.000000e+00 : f32
    %504 = vector.broadcast %cst_139 : f32 to vector<8x32xf32>
    %505 = arith.addf %504, %503 : vector<8x32xf32>
    %506 = arith.divf %504, %505 : vector<8x32xf32>
    %507 = arith.mulf %498, %478 : vector<8x32xf32>
    %508 = arith.mulf %492, %500 : vector<8x32xf32>
    %509 = arith.addf %507, %508 : vector<8x32xf32>
    %510 = math.tanh %509 : vector<8x32xf32>
    %511 = arith.mulf %506, %510 : vector<8x32xf32>
    %c7_i32_140 = arith.constant 7 : i32
    %c8_i32_141 = arith.constant 8 : i32
    %512 = arith.muli %c7_i32_140, %c8_i32_141 : i32
    %513 = tpu.assume_multiple %512, 8 : i32
    %514 = arith.index_cast %513 : i32 to index
    %c0_142 = arith.constant 0 : index
    %515 = vector.load %arg12[%514, %c0_142] : memref<64x128xf32, #tpu.memory_space<vmem>>, vector<8x128xf32>
    %cst_143 = arith.constant dense<0.000000e+00> : vector<8x128xf32>
    %516 = tpu.matmul %511, %290, %cst_143 {dimension_numbers = #tpu.dot_dimension_numbers<[1], [0], [0], [1], [0, 0, 1, 1], [], []>} : vector<8x32xf32>, vector<32x128xf32>, vector<8x128xf32> -> vector<8x128xf32>
    %517 = arith.addf %515, %516 : vector<8x128xf32>
    %518 = vector.extract_strided_slice %517 {offsets = [0, 0], sizes = [8, 32], strides = [1, 1]} : vector<8x128xf32> to vector<8x32xf32>
    %519 = arith.negf %518 : vector<8x32xf32>
    %520 = math.exp %519 : vector<8x32xf32>
    %cst_144 = arith.constant 1.000000e+00 : f32
    %521 = vector.broadcast %cst_144 : f32 to vector<8x32xf32>
    %522 = arith.addf %521, %520 : vector<8x32xf32>
    %523 = arith.divf %521, %522 : vector<8x32xf32>
    %524 = vector.extract_strided_slice %517 {offsets = [0, 32], sizes = [8, 32], strides = [1, 1]} : vector<8x128xf32> to vector<8x32xf32>
    %525 = arith.negf %524 : vector<8x32xf32>
    %526 = math.exp %525 : vector<8x32xf32>
    %cst_145 = arith.constant 1.000000e+00 : f32
    %527 = vector.broadcast %cst_145 : f32 to vector<8x32xf32>
    %528 = arith.addf %527, %526 : vector<8x32xf32>
    %529 = arith.divf %527, %528 : vector<8x32xf32>
    %530 = vector.extract_strided_slice %517 {offsets = [0, 64], sizes = [8, 32], strides = [1, 1]} : vector<8x128xf32> to vector<8x32xf32>
    %531 = math.tanh %530 : vector<8x32xf32>
    %532 = vector.extract_strided_slice %517 {offsets = [0, 96], sizes = [8, 32], strides = [1, 1]} : vector<8x128xf32> to vector<8x32xf32>
    %533 = arith.negf %532 : vector<8x32xf32>
    %534 = math.exp %533 : vector<8x32xf32>
    %cst_146 = arith.constant 1.000000e+00 : f32
    %535 = vector.broadcast %cst_146 : f32 to vector<8x32xf32>
    %536 = arith.addf %535, %534 : vector<8x32xf32>
    %537 = arith.divf %535, %536 : vector<8x32xf32>
    %538 = arith.mulf %529, %509 : vector<8x32xf32>
    %539 = arith.mulf %523, %531 : vector<8x32xf32>
    %540 = arith.addf %538, %539 : vector<8x32xf32>
    %541 = math.tanh %540 : vector<8x32xf32>
    %542 = arith.mulf %537, %541 : vector<8x32xf32>
    %c8_i32_147 = arith.constant 8 : i32
    %c0_148 = arith.constant 0 : index
    %c0_149 = arith.constant 0 : index
    %543 = vector.load %arg8[%c0_148, %c0_149] : memref<32x4xf32, #tpu.memory_space<vmem>>, vector<32x4xf32>
    %cst_150 = arith.constant dense<0.000000e+00> : vector<8x4xf32>
    %544 = tpu.matmul %542, %543, %cst_150 {dimension_numbers = #tpu.dot_dimension_numbers<[1], [0], [0], [1], [0, 0, 1, 1], [], []>} : vector<8x32xf32>, vector<32x4xf32>, vector<8x4xf32> -> vector<8x4xf32>
    %c0_151 = arith.constant 0 : index
    %c0_152 = arith.constant 0 : index
    %545 = vector.load %arg9[%c0_151, %c0_152] : memref<1x4xf32, #tpu.memory_space<vmem>>, vector<1x4xf32>
    %546 = vector.broadcast %545 : vector<1x4xf32> to vector<8x4xf32>
    %547 = arith.addf %544, %546 : vector<8x4xf32>
    %c0_153 = arith.constant 0 : index
    %c0_154 = arith.constant 0 : index
    %548 = vector.load %arg10[%c0_153, %c0_154] : memref<8x4xf32, #tpu.memory_space<vmem>>, vector<8x4xf32>
    tpu.vector_store %arg10[%c0_153, %c0_154], %547 {strides = array<i32>} : memref<8x4xf32, #tpu.memory_space<vmem>>, vector<8x4xf32>,
    return
  }
  func.func @transform_0(%arg0: i32) -> (i32, i32) {
    %c0_i32 = arith.constant 0 : i32
    %c0_i32_0 = arith.constant 0 : i32
    %c0_i32_1 = arith.constant 0 : i32
    return %c0_i32, %c0_i32_0 : i32, i32
  }
  func.func @transform_1(%arg0: i32) -> (i32, i32) {
    %c0_i32 = arith.constant 0 : i32
    %c0_i32_0 = arith.constant 0 : i32
    %c0_i32_1 = arith.constant 0 : i32
    return %c0_i32, %c0_i32_0 : i32, i32
  }
  func.func @transform_2(%arg0: i32) -> (i32, i32, i32) {
    %c0_i32 = arith.constant 0 : i32
    %c0_i32_0 = arith.constant 0 : i32
    %c0_i32_1 = arith.constant 0 : i32
    %c0_i32_2 = arith.constant 0 : i32
    return %c0_i32, %c0_i32_0, %c0_i32_1 : i32, i32, i32
  }
  func.func @transform_3(%arg0: i32) -> (i32, i32, i32) {
    %c0_i32 = arith.constant 0 : i32
    %c0_i32_0 = arith.constant 0 : i32
    %c0_i32_1 = arith.constant 0 : i32
    %c0_i32_2 = arith.constant 0 : i32
    return %c0_i32, %c0_i32_0, %c0_i32_1 : i32, i32, i32
  }
  func.func @transform_4(%arg0: i32) -> (i32, i32, i32) {
    %c0_i32 = arith.constant 0 : i32
    %c0_i32_0 = arith.constant 0 : i32
    %c0_i32_1 = arith.constant 0 : i32
    %c0_i32_2 = arith.constant 0 : i32
    return %c0_i32, %c0_i32_0, %c0_i32_1 : i32, i32, i32
  }
  func.func @transform_5(%arg0: i32) -> (i32, i32, i32) {
    %c0_i32 = arith.constant 0 : i32
    %c0_i32_0 = arith.constant 0 : i32
    %c0_i32_1 = arith.constant 0 : i32
    %c0_i32_2 = arith.constant 0 : i32
    return %c0_i32, %c0_i32_0, %c0_i32_1 : i32, i32, i32
  }
  func.func @transform_6(%arg0: i32) -> (i32, i32, i32) {
    %c0_i32 = arith.constant 0 : i32
    %c0_i32_0 = arith.constant 0 : i32
    %c0_i32_1 = arith.constant 0 : i32
    %c0_i32_2 = arith.constant 0 : i32
    return %c0_i32, %c0_i32_0, %c0_i32_1 : i32, i32, i32
  }
  func.func @transform_7(%arg0: i32) -> (i32, i32) {
    %c0_i32 = arith.constant 0 : i32
    %c0_i32_0 = arith.constant 0 : i32
    %c0_i32_1 = arith.constant 0 : i32
    return %c0_i32, %c0_i32_0 : i32, i32
  }
  func.func @transform_8(%arg0: i32) -> (i32, i32) {
    %c0_i32 = arith.constant 0 : i32
    %c0_i32_0 = arith.constant 0 : i32
    %c0_i32_1 = arith.constant 0 : i32
    return %c0_i32, %c0_i32_0 : i32, i32
  }
  func.func @transform_9(%arg0: i32) -> (i32, i32) {
    %c0_i32 = arith.constant 0 : i32
    %c0_i32_0 = arith.constant 0 : i32
    %c0_i32_1 = arith.constant 0 : i32
    return %c0_i32, %c0_i32_0 : i32, i32
  }
}

</mosaic_0001>

<bundles_post_ra>
// kernel: lstm_forward.1
= control target key start
LH: loop header
LB: loop body
LE: loop exit
PB: predicated region body
PF: predicated region fallthrough
CT: control target
= control target key end

     0   :  { %v2527_v0 = vmov 0.0   ;;  %vm2528_vm0 = vmmov 0   ;;  %v2529_v3 = vmov 0   ;;  %s2530_s21 = smov 32   ;;  %vm125_vm1 = vcmask 261120   ;;  %s2531_s28 = smov 64   ;;  %s3015_s3 = inlined_call_operand.vmem [shape: f32[2,32,128], index: 3, kind: input, shape index: {}]   ;;  %s3016_s0 = inlined_call_operand.vmem [shape: f32[64,1], index: 0, kind: input, shape index: {}]   ;;  %s3017_s6 = inlined_call_operand.vmem [shape: f32[2,8,32], index: 6, kind: input, shape index: {}]   ;;  %s3018_s5 = inlined_call_operand.vmem [shape: f32[2,8,32], index: 5, kind: input, shape index: {}]   ;;  %s3019_s1 = inlined_call_operand.vmem [shape: f32[1,128], index: 1, kind: input, shape index: {}]   ;;  %s3020_s4 = inlined_call_operand.vmem [shape: f32[2,1,128], index: 4, kind: input, shape index: {}]   ;;  %s3021_s2 = inlined_call_operand.vmem [shape: f32[1,32,128], index: 2, kind: input, shape index: {}]   ;;  %s3022_s7 = inlined_call_operand.vmem [shape: f32[32,4], index: 7, kind: input, shape index: {}]   ;;  %s3023_s8 = inlined_call_operand.vmem [shape: f32[1,4], index: 8, kind: input, shape index: {}]   ;;  %s3024_s9 = inlined_call_operand.vmem [shape: f32[8,4], index: 9, kind: output, shape index: {}]  }
   0x1   :  { %2185 = vmatprep.subr.mxu0 %v2527_v0  ;;  %v2586_v1 = vld [vmem:[%s3015_s3 + $0x18] sm:$0xff]  ;;  %v2591_v2 = vld [vmem:[%s3015_s3 + $0x10] sm:$0xff]  ;;  %2193 = vmatprep.mubr.msk.f32.mxu0 %vm2528_vm0, %v2527_v0  ;;  %v2600_v4 = vld [vmem:[%s3015_s3 + $0x8] sm:$0xff]  ;;  %vm2030_vm2 = vcmask 31744  }
   0x2   :  { %2186 = vmatpush3.msra.mxu0 %v2586_v1  ;;  %2397 = vset.pattern.permute.xlu0 %v2529_v3  ;;  %v32_v5 = vld [vmem:[%s3016_s0] sm:$0xff]  ;;  %v33_v29 = vld [vmem:[%s3016_s0 + $0x8] sm:$0xff]  ;;  %v34_v50 = vld [vmem:[%s3016_s0 + $0x10] sm:$0xff] }
   0x3   :  { %2187 = vmatprep.subr.mxu0 %v2527_v0  ;;  %v123_v6 = vld [vmem:[%s3017_s6] sm:$0xff]  ;;  %2196 = vmatprep.subr.mxu1 %v2527_v0 }
   0x4   :  { %2188 = vmatpush3.msra.mxu0 %v2591_v2  ;;  %43 = vperm.xlu0 %2397, %v32_v5   ;;  %v2614_v7 = vld [vmem:[%s3015_s3] sm:$0xff] }
   0x5   :  { %2189 = vmatprep.subr.mxu0 %v2527_v0  ;;  %208 = vrot.lane.b32.xlu1 %v123_v6, %s2530_s21  ;;  %v122_v8 = vld [vmem:[%s3018_s5] sm:$0xff] }
   0x6   :  { %2190 = vmatpush3.msra.mxu0 %v2600_v4  ;;  %2197 = vmatpush3.msra.mxu1 %v2586_v1  ;;  %v2648_v9 = vld [vmem:[%s3019_s1] ss:$0 sm:$0xff] }
   0x7   :  { %2191 = vmatprep.subr.mxu0 %v2527_v0  ;;  %2198 = vmatprep.subr.mxu1 %v2527_v0  ;;  %v2654_v12 = vld [vmem:[%s3020_s4] ss:$0 sm:$0xff] }
   0x8   :  { %2192 = vmatpush3.msra.mxu0 %v2614_v7  ;;  %2199 = vmatpush3.msra.mxu1 %v2591_v2 }
   0x9   :  { %2194 = vmatmul.mubr.msk.f32.vlgmr.msra.gmra.mxu0 %vm125_vm1, %v122_v8  ;;  %2200 = vmatprep.subr.mxu1 %v2527_v0 }
   0xa   :  { %2201 = vmatpush3.msra.mxu1 %v2600_v4  ;;  %2204 = vmatprep.mubr.msk.f32.mxu1 %vm2528_vm0, %v2527_v0 }
   0xb   :  { %2202 = vmatprep.subr.mxu1 %v2527_v0  ;;  %2207 = vmatprep.subr.mxu0 %v2527_v0 }
   0xc   :  { %2203 = vmatpush3.msra.mxu1 %v2614_v7  ;;  %2208 = vmatpush3.msra.mxu0 %v2586_v1 }
   0xd   :  { %2209 = vmatprep.subr.mxu0 %v2527_v0  ;;  %2215 = vmatprep.mubr.msk.f32.mxu0 %vm2528_vm0, %v2527_v0 }
   0xe   :  { %2210 = vmatpush3.msra.mxu0 %v2591_v2  ;;  %2398 = vset.pattern.permute.xlu1 %v2529_v3 }
   0xf   :  { %2211 = vmatprep.subr.mxu0 %v2527_v0  ;;  %2218 = vmatprep.subr.mxu1 %v2527_v0 }
  0x10   :  { %2212 = vmatpush3.msra.mxu0 %v2600_v4 }
  0x11   :  { %2213 = vmatprep.subr.mxu0 %v2527_v0 }
  0x12   :  { %2214 = vmatpush3.msra.mxu0 %v2614_v7 }
  0x13   :  { %2229 = vmatprep.subr.mxu0 %v2527_v0 }
  0x77   :  { %v209_v24 = vpop.permute.xlu1 %208 }
  0x7f   :  { %v44_v10 = vpop.permute.xlu0 %43 }
  0x80   :  { %v87_v11 = vmul.f32 %v2648_v9, %v44_v10 }
  0x82   :  { %v102_v13 = vadd.f32 %v2654_v12, %v87_v11 }
  0xc9   :  { %v195_v14 = vpop.f32.mrf.mxu0 }
  0xca   :  { %v199_v15 = vadd.f32 %v195_v14, %v102_v13  ;;  %v35_v14 = vld [vmem:[%s3016_s0 + $0x18] sm:$0xff] }
  0xcb   :  { %v2195_v16 = vpop.f32.mrf.mxu0 }
  0xcc   :  { %2399 = vtanh.f32 %v199_v15  ;;  %v2039_v18 = vmul.f32 -1.442695, %v199_v15 }
  0xce   :  { %2401 = vpow2.f32 %v2039_v18 }
  0xd9   :  { %v2400_v17 = vpop.eup %2399 }
  0xda   :  { %213 = vrot.lane.b32.xlu0 %v2400_v17, %s2531_s28 }
  0xdb   :  { %v2402_v19 = vpop.eup %2401 }
  0xdc   :  { %v203_v20 = vadd.f32 1.0, %v2402_v19 }
  0xde   :  { %2403 = vrcp.f32 %v203_v20 }
  0xeb   :  { %v2404_v21 = vpop.eup %2403 }
  0xec   :  { %v211_v25 = vmul.f32 %v2404_v21, %v209_v24 }
 0x14c   :  { %v214_v22 = vpop.permute.xlu0 %213 }
 0x14d   :  { %v216_v23 = vmul.f32 %v2404_v21, %v214_v22 }
 0x14f   :  { %218 = vrot.lane.b32.xlu1 %v216_v23, %s2530_s21 }
 0x1c1   :  { %v219_v26 = vpop.permute.xlu1 %218 }
 0x1c2   :  { %v221_v27 = vadd.f32 %v219_v26, %v211_v25 }
 0x1c4   :  { %2405 = vtanh.f32 %v221_v27 }
 0x1d1   :  { %v2406_v28 = vpop.eup %2405 }
 0x1d2   :  { %224 = vrot.lane.b32.xlu0 %v2406_v28, %s2531_s28 }
 0x1d6   :  { %48 = vperm.xlu0 %2397, %v33_v29  }
 0x244   :  { %v225_v30 = vpop.permute.xlu0 %224 }
 0x245   :  { %v227_v31 = vmul.f32 %v2404_v21, %v225_v30 }
 0x247   :  { %229 = vrot.lane.b32.xlu1 %v227_v31, %s2530_s21 }
 0x251   :  { %v49_v33 = vpop.permute.xlu0 %48 }
 0x252   :  { %v88_v34 = vmul.f32 %v2648_v9, %v49_v33 }
 0x254   :  { %v103_v35 = vadd.f32 %v2654_v12, %v88_v34 }
 0x2b9   :  { %v230_v32 = vpop.permute.xlu1 %229 }
 0x2ba   :  { %232 = vst.msk [vmem:[#allocation2] sm:$0xff] %vm125_vm1, %v230_v32  ;;  %2205 = vmatmul.mubr.msk.f32.vlgmr.msra.gmra.mxu1 %vm125_vm1, %v230_v32 }
 0x2bb   :  { %2219 = vmatpush3.msra.mxu1 %v2586_v1  ;;  %2226 = vmatprep.mubr.msk.f32.mxu1 %vm2528_vm0, %v2527_v0 }
 0x2bc   :  { %2220 = vmatprep.subr.mxu1 %v2527_v0 }
 0x2bd   :  { %2221 = vmatpush3.msra.mxu1 %v2591_v2 }
 0x2be   :  { %2222 = vmatprep.subr.mxu1 %v2527_v0 }
 0x2bf   :  { %2223 = vmatpush3.msra.mxu1 %v2600_v4 }
 0x2c0   :  { %2224 = vmatprep.subr.mxu1 %v2527_v0 }
 0x2c1   :  { %2225 = vmatpush3.msra.mxu1 %v2614_v7 }
 0x2c2   :  { %2240 = vmatprep.subr.mxu1 %v2527_v0 }
 0x37a   :  { %v303_v36 = vpop.f32.mrf.mxu1 }
 0x37b   :  { %v307_v37 = vadd.f32 %v303_v36, %v103_v35  ;;  %v36_v35 = vld [vmem:[%s3016_s0 + $0x20] sm:$0xff] }
 0x37c   :  { %v2206_v38 = vpop.f32.mrf.mxu1 }
 0x37d   :  { %2407 = vtanh.f32 %v307_v37  ;;  %v2041_v40 = vmul.f32 -1.442695, %v307_v37 }
 0x37f   :  { %2409 = vpow2.f32 %v2041_v40 }
 0x38a   :  { %v2408_v39 = vpop.eup %2407 }
 0x38b   :  { %317 = vrot.lane.b32.xlu1 %v2408_v39, %s2531_s28 }
 0x38c   :  { %v2410_v41 = vpop.eup %2409 }
 0x38d   :  { %v311_v42 = vadd.f32 1.0, %v2410_v41 }
 0x38f   :  { %2411 = vrcp.f32 %v311_v42 }
 0x39c   :  { %v2412_v43 = vpop.eup %2411 }
 0x39d   :  { %v315_v46 = vmul.f32 %v2412_v43, %v221_v27 }
 0x3fd   :  { %v318_v44 = vpop.permute.xlu1 %317 }
 0x3fe   :  { %v320_v45 = vmul.f32 %v2412_v43, %v318_v44 }
 0x400   :  { %322 = vrot.lane.b32.xlu0 %v320_v45, %s2530_s21 }
 0x472   :  { %v323_v47 = vpop.permute.xlu0 %322 }
 0x473   :  { %v325_v48 = vadd.f32 %v323_v47, %v315_v46 }
 0x475   :  { %2413 = vtanh.f32 %v325_v48 }
 0x482   :  { %v2414_v49 = vpop.eup %2413 }
 0x483   :  { %328 = vrot.lane.b32.xlu1 %v2414_v49, %s2531_s28 }
 0x487   :  { %53 = vperm.xlu1 %2398, %v34_v50  }
 0x4f5   :  { %v329_v51 = vpop.permute.xlu1 %328 }
 0x4f6   :  { %v331_v52 = vmul.f32 %v2412_v43, %v329_v51 }
 0x4f8   :  { %333 = vrot.lane.b32.xlu0 %v331_v52, %s2530_s21 }
 0x502   :  { %v54_v54 = vpop.permute.xlu1 %53 }
 0x503   :  { %v89_v55 = vmul.f32 %v2648_v9, %v54_v54 }
 0x505   :  { %v104_v56 = vadd.f32 %v2654_v12, %v89_v55 }
 0x56a   :  { %v334_v53 = vpop.permute.xlu0 %333 }
 0x56b   :  { %337 = vst.msk [vmem:[#allocation2 + $0x8] sm:$0xff] %vm125_vm1, %v334_v53  ;;  %2216 = vmatmul.mubr.msk.f32.vlgmr.msra.gmra.mxu0 %vm125_vm1, %v334_v53 }
 0x56c   :  { %2230 = vmatpush3.msra.mxu0 %v2586_v1  ;;  %2237 = vmatprep.mubr.msk.f32.mxu0 %vm2528_vm0, %v2527_v0 }
 0x56d   :  { %2231 = vmatprep.subr.mxu0 %v2527_v0 }
 0x56e   :  { %2232 = vmatpush3.msra.mxu0 %v2591_v2 }
 0x56f   :  { %2233 = vmatprep.subr.mxu0 %v2527_v0 }
 0x570   :  { %2234 = vmatpush3.msra.mxu0 %v2600_v4 }
 0x571   :  { %2235 = vmatprep.subr.mxu0 %v2527_v0 }
 0x572   :  { %2236 = vmatpush3.msra.mxu0 %v2614_v7 }
 0x573   :  { %2251 = vmatprep.subr.mxu0 %v2527_v0 }
 0x62b   :  { %v408_v57 = vpop.f32.mrf.mxu0 }
 0x62c   :  { %v412_v58 = vadd.f32 %v408_v57, %v104_v56  ;;  %v37_v56 = vld [vmem:[%s3016_s0 + $0x28] sm:$0xff] }
 0x62d   :  { %v2217_v59 = vpop.f32.mrf.mxu0 }
 0x62e   :  { %2415 = vtanh.f32 %v412_v58  ;;  %v2043_v61 = vmul.f32 -1.442695, %v412_v58 }
 0x630   :  { %2417 = vpow2.f32 %v2043_v61 }
 0x63b   :  { %v2416_v60 = vpop.eup %2415 }
 0x63c   :  { %422 = vrot.lane.b32.xlu0 %v2416_v60, %s2531_s28 }
 0x63d   :  { %v2418_v62 = vpop.eup %2417 }
 0x63e   :  { %v416_v63 = vadd.f32 1.0, %v2418_v62 }
 0x640   :  { %2419 = vrcp.f32 %v416_v63 }
 0x64d   :  { %v2420_v3 = vpop.eup %2419 }
 0x64e   :  { %v420_v8 = vmul.f32 %v2420_v3, %v325_v48 }
 0x6ae   :  { %v423_v5 = vpop.permute.xlu0 %422 }
 0x6af   :  { %v425_v6 = vmul.f32 %v2420_v3, %v423_v5 }
 0x6b1   :  { %427 = vrot.lane.b32.xlu1 %v425_v6, %s2530_s21 }
 0x723   :  { %v428_v10 = vpop.permute.xlu1 %427 }
 0x724   :  { %v430_v11 = vadd.f32 %v428_v10, %v420_v8 }
 0x726   :  { %2421 = vtanh.f32 %v430_v11 }
 0x733   :  { %v2422_v13 = vpop.eup %2421 }
 0x734   :  { %433 = vrot.lane.b32.xlu0 %v2422_v13, %s2531_s28 }
 0x738   :  { %58 = vperm.xlu0 %2397, %v35_v14  }
 0x7a6   :  { %v434_v15 = vpop.permute.xlu0 %433 }
 0x7a7   :  { %v436_v16 = vmul.f32 %v2420_v3, %v434_v15 }
 0x7a9   :  { %438 = vrot.lane.b32.xlu1 %v436_v16, %s2530_s21  ;;  %v38_v16 = vld [vmem:[%s3016_s0 + $0x30] sm:$0xff] }
 0x7b3   :  { %v59_v18 = vpop.permute.xlu0 %58 }
 0x7b4   :  { %v90_v19 = vmul.f32 %v2648_v9, %v59_v18 }
 0x7b6   :  { %v105_v20 = vadd.f32 %v2654_v12, %v90_v19 }
 0x81b   :  { %v439_v17 = vpop.permute.xlu1 %438 }
 0x81c   :  { %442 = vst.msk [vmem:[#allocation2 + $0x10] sm:$0xff] %vm125_vm1, %v439_v17  ;;  %2227 = vmatmul.mubr.msk.f32.vlgmr.msra.gmra.mxu1 %vm125_vm1, %v439_v17  ;;  %v979_v17 = vld [vmem:[%s3021_s2 + $0x18] sm:$0xff] }
 0x81d   :  { %2241 = vmatpush3.msra.mxu1 %v2586_v1  ;;  %2248 = vmatprep.mubr.msk.f32.mxu1 %vm2528_vm0, %v2527_v0 }
 0x81e   :  { %2242 = vmatprep.subr.mxu1 %v2527_v0 }
 0x81f   :  { %2243 = vmatpush3.msra.mxu1 %v2591_v2 }
 0x820   :  { %2244 = vmatprep.subr.mxu1 %v2527_v0 }
 0x821   :  { %2245 = vmatpush3.msra.mxu1 %v2600_v4 }
 0x822   :  { %2246 = vmatprep.subr.mxu1 %v2527_v0 }
 0x823   :  { %2247 = vmatpush3.msra.mxu1 %v2614_v7 }
 0x824   :  { %2262 = vmatprep.subr.mxu1 %v2527_v0 }
 0x8dc   :  { %v513_v21 = vpop.f32.mrf.mxu1 }
 0x8dd   :  { %v517_v22 = vadd.f32 %v513_v21, %v105_v20  ;;  %v978_v21 = vld [vmem:[%s3021_s2 + $0x10] sm:$0xff] }
 0x8de   :  { %v2228_v23 = vpop.f32.mrf.mxu1 }
 0x8df   :  { %2423 = vtanh.f32 %v517_v22  ;;  %v2045_v25 = vmul.f32 -1.442695, %v517_v22  ;;  %v968_v22 = vld [vmem:[#allocation2] sm:$0xff]  ;;  %v977_v23 = vld [vmem:[%s3021_s2 + $0x8] sm:$0xff] }
 0x8e1   :  { %2425 = vpow2.f32 %v2045_v25  ;;  %v969_v25 = vld [vmem:[#allocation2 + $0x8] sm:$0xff] }
 0x8ec   :  { %v2424_v24 = vpop.eup %2423 }
 0x8ed   :  { %527 = vrot.lane.b32.xlu1 %v2424_v24, %s2531_s28  ;;  %v976_v24 = vld [vmem:[%s3021_s2] sm:$0xff] }
 0x8ee   :  { %v2426_v26 = vpop.eup %2425 }
 0x8ef   :  { %v521_v27 = vadd.f32 1.0, %v2426_v26  ;;  %v970_v26 = vld [vmem:[#allocation2 + $0x10] sm:$0xff] }
 0x8f1   :  { %2427 = vrcp.f32 %v521_v27 }
 0x8fe   :  { %v2428_v28 = vpop.eup %2427 }
 0x8ff   :  { %v525_v31 = vmul.f32 %v2428_v28, %v430_v11 }
 0x95f   :  { %v528_v29 = vpop.permute.xlu1 %527 }
 0x960   :  { %v530_v30 = vmul.f32 %v2428_v28, %v528_v29 }
 0x962   :  { %532 = vrot.lane.b32.xlu0 %v530_v30, %s2530_s21 }
 0x9d4   :  { %v533_v32 = vpop.permute.xlu0 %532 }
 0x9d5   :  { %v535_v33 = vadd.f32 %v533_v32, %v525_v31 }
 0x9d7   :  { %2429 = vtanh.f32 %v535_v33 }
 0x9e4   :  { %v2430_v34 = vpop.eup %2429 }
 0x9e5   :  { %538 = vrot.lane.b32.xlu1 %v2430_v34, %s2531_s28 }
 0x9e9   :  { %63 = vperm.xlu1 %2398, %v36_v35  }
 0xa57   :  { %v539_v36 = vpop.permute.xlu1 %538 }
 0xa58   :  { %v541_v37 = vmul.f32 %v2428_v28, %v539_v36 }
 0xa5a   :  { %543 = vrot.lane.b32.xlu0 %v541_v37, %s2530_s21 }
 0xa64   :  { %v64_v39 = vpop.permute.xlu1 %63 }
 0xa65   :  { %v91_v40 = vmul.f32 %v2648_v9, %v64_v39 }
 0xa67   :  { %v106_v41 = vadd.f32 %v2654_v12, %v91_v40 }
 0xacc   :  { %v544_v38 = vpop.permute.xlu0 %543 }
 0xacd   :  { %547 = vst.msk [vmem:[#allocation2 + $0x18] sm:$0xff] %vm125_vm1, %v544_v38  ;;  %2238 = vmatmul.mubr.msk.f32.vlgmr.msra.gmra.mxu0 %vm125_vm1, %v544_v38 }
 0xace   :  { %2252 = vmatpush3.msra.mxu0 %v2586_v1  ;;  %2259 = vmatprep.mubr.msk.f32.mxu0 %vm2528_vm0, %v2527_v0 }
 0xacf   :  { %2253 = vmatprep.subr.mxu0 %v2527_v0 }
 0xad0   :  { %2254 = vmatpush3.msra.mxu0 %v2591_v2 }
 0xad1   :  { %2255 = vmatprep.subr.mxu0 %v2527_v0 }
 0xad2   :  { %2256 = vmatpush3.msra.mxu0 %v2600_v4 }
 0xad3   :  { %2257 = vmatprep.subr.mxu0 %v2527_v0 }
 0xad4   :  { %2258 = vmatpush3.msra.mxu0 %v2614_v7  ;;  %v971_v27 = vld [vmem:[#allocation2 + $0x18] sm:$0xff] }
 0xad5   :  { %2273 = vmatprep.subr.mxu0 %v979_v17 }
 0xb8d   :  { %v618_v42 = vpop.f32.mrf.mxu0 }
 0xb8e   :  { %v622_v43 = vadd.f32 %v618_v42, %v106_v41 }
 0xb8f   :  { %v2239_v44 = vpop.f32.mrf.mxu0 }
 0xb90   :  { %2431 = vtanh.f32 %v622_v43  ;;  %v2047_v46 = vmul.f32 -1.442695, %v622_v43 }
 0xb92   :  { %2433 = vpow2.f32 %v2047_v46 }
 0xb9d   :  { %v2432_v45 = vpop.eup %2431 }
 0xb9e   :  { %632 = vrot.lane.b32.xlu0 %v2432_v45, %s2531_s28 }
 0xb9f   :  { %v2434_v47 = vpop.eup %2433 }
 0xba0   :  { %v626_v48 = vadd.f32 1.0, %v2434_v47  ;;  %v2800_v47 = vld [vmem:[%s3015_s3 + $0x38] sm:$0xff] }
 0xba2   :  { %2435 = vrcp.f32 %v626_v48  ;;  %v2806_v48 = vld [vmem:[%s3015_s3 + $0x30] sm:$0xff] }
 0xbaf   :  { %v2436_v49 = vpop.eup %2435 }
 0xbb0   :  { %v630_v52 = vmul.f32 %v2436_v49, %v535_v33 }
 0xc10   :  { %v633_v50 = vpop.permute.xlu0 %632 }
 0xc11   :  { %v635_v51 = vmul.f32 %v2436_v49, %v633_v50  ;;  %v2820_v50 = vld [vmem:[%s3015_s3 + $0x20] sm:$0xff] }
 0xc13   :  { %637 = vrot.lane.b32.xlu1 %v635_v51, %s2530_s21 }
 0xc85   :  { %v638_v53 = vpop.permute.xlu1 %637 }
 0xc86   :  { %v640_v54 = vadd.f32 %v638_v53, %v630_v52  ;;  %v2069_v53 = vld [vmem:[%s3017_s6 + $0x8] sm:$0xff] }
 0xc88   :  { %2437 = vtanh.f32 %v640_v54 }
 0xc95   :  { %v2438_v55 = vpop.eup %2437 }
 0xc96   :  { %643 = vrot.lane.b32.xlu0 %v2438_v55, %s2531_s28  ;;  %v2068_v55 = vld [vmem:[%s3018_s5 + $0x8] sm:$0xff] }
 0xc9a   :  { %68 = vperm.xlu0 %2397, %v37_v56  }
 0xd08   :  { %v644_v57 = vpop.permute.xlu0 %643 }
 0xd09   :  { %v646_v58 = vmul.f32 %v2436_v49, %v644_v57  ;;  %v2813_v49 = vld [vmem:[%s3015_s3 + $0x28] sm:$0xff] }
 0xd0b   :  { %648 = vrot.lane.b32.xlu1 %v646_v58, %s2530_s21 }
 0xd15   :  { %v69_v60 = vpop.permute.xlu0 %68 }
 0xd7d   :  { %v649_v59 = vpop.permute.xlu1 %648 }
 0xd7e   :  { %652 = vst.msk [vmem:[#allocation2 + $0x20] sm:$0xff] %vm125_vm1, %v649_v59  ;;  %2249 = vmatmul.mubr.msk.f32.vlgmr.msra.gmra.mxu1 %vm125_vm1, %v649_v59 }
 0xd7f   :  { %2263 = vmatpush3.msra.mxu1 %v2586_v1  ;;  %2270 = vmatprep.mubr.msk.f32.mxu1 %vm2528_vm0, %v2527_v0  ;;  %v92_v1 = vmul.f32 %v2648_v9, %v69_v60 }
 0xd80   :  { %2264 = vmatprep.subr.mxu1 %v2527_v0 }
 0xd81   :  { %2265 = vmatpush3.msra.mxu1 %v2591_v2  ;;  %v107_v61 = vadd.f32 %v2654_v12, %v92_v1  ;;  %v2862_v1 = vld [vmem:[%s3020_s4 + $0x1] ss:$0 sm:$0xff] }
 0xd82   :  { %2266 = vmatprep.subr.mxu1 %v2527_v0 }
 0xd83   :  { %2267 = vmatpush3.msra.mxu1 %v2600_v4 }
 0xd84   :  { %2268 = vmatprep.subr.mxu1 %v2527_v0 }
 0xd85   :  { %2269 = vmatpush3.msra.mxu1 %v2614_v7  ;;  %v972_v28 = vld [vmem:[#allocation2 + $0x20] sm:$0xff] }
 0xd86   :  { %2293 = vmatprep.subr.mxu1 %v2527_v0 }
 0xe3e   :  { %v723_v62 = vpop.f32.mrf.mxu1 }
 0xe3f   :  { %v727_v63 = vadd.f32 %v723_v62, %v107_v61 }
 0xe40   :  { %v2250_v3 = vpop.f32.mrf.mxu1 }
 0xe41   :  { %2439 = vtanh.f32 %v727_v63  ;;  %v2049_v5 = vmul.f32 -1.442695, %v727_v63 }
 0xe43   :  { %2441 = vpow2.f32 %v2049_v5 }
 0xe4e   :  { %v2440_v2 = vpop.eup %2439 }
 0xe4f   :  { %737 = vrot.lane.b32.xlu1 %v2440_v2, %s2531_s28 }
 0xe50   :  { %v2442_v4 = vpop.eup %2441 }
 0xe51   :  { %v731_v6 = vadd.f32 1.0, %v2442_v4 }
 0xe53   :  { %2443 = vrcp.f32 %v731_v6 }
 0xe60   :  { %v2444_v7 = vpop.eup %2443 }
 0xe61   :  { %v735_v11 = vmul.f32 %v2444_v7, %v640_v54 }
 0xec1   :  { %v738_v8 = vpop.permute.xlu1 %737 }
 0xec2   :  { %v740_v10 = vmul.f32 %v2444_v7, %v738_v8 }
 0xec4   :  { %742 = vrot.lane.b32.xlu0 %v740_v10, %s2530_s21 }
 0xf36   :  { %v743_v13 = vpop.permute.xlu0 %742 }
 0xf37   :  { %v745_v14 = vadd.f32 %v743_v13, %v735_v11 }
 0xf39   :  { %2445 = vtanh.f32 %v745_v14 }
 0xf46   :  { %v2446_v15 = vpop.eup %2445 }
 0xf47   :  { %748 = vrot.lane.b32.xlu1 %v2446_v15, %s2531_s28 }
 0xf4b   :  { %73 = vperm.xlu1 %2398, %v38_v16  }
 0xfb9   :  { %v749_v18 = vpop.permute.xlu1 %748 }
 0xfba   :  { %v751_v19 = vmul.f32 %v2444_v7, %v749_v18 }
 0xfbc   :  { %753 = vrot.lane.b32.xlu0 %v751_v19, %s2530_s21 }
 0xfc6   :  { %v74_v30 = vpop.permute.xlu1 %73 }
 0xfc7   :  { %v93_v31 = vmul.f32 %v2648_v9, %v74_v30 }
 0xfc9   :  { %v108_v32 = vadd.f32 %v2654_v12, %v93_v31 }
0x102e   :  { %v754_v20 = vpop.permute.xlu0 %753 }
0x102f   :  { %757 = vst.msk [vmem:[#allocation2 + $0x28] sm:$0xff] %vm125_vm1, %v754_v20  ;;  %2260 = vmatmul.mubr.msk.f32.vlgmr.msra.gmra.mxu0 %vm125_vm1, %v754_v20 }
0x1030   :  { %2274 = vmatpush3.msra.mxu0 %v979_v17  ;;  %2281 = vmatprep.mubr.msk.f32.mxu0 %vm125_vm1, %v968_v22  ;;  %v39_v17 = vld [vmem:[%s3016_s0 + $0x38] sm:$0xff] }
0x1031   :  { %2275 = vmatprep.subr.mxu0 %v978_v21 }
0x1032   :  { %2276 = vmatpush3.msra.mxu0 %v978_v21 }
0x1033   :  { %2277 = vmatprep.subr.mxu0 %v977_v23 }
0x1034   :  { %2278 = vmatpush3.msra.mxu0 %v977_v23 }
0x1035   :  { %2279 = vmatprep.subr.mxu0 %v976_v24 }
0x1036   :  { %2280 = vmatpush3.msra.mxu0 %v976_v24  ;;  %v973_v29 = vld [vmem:[#allocation2 + $0x28] sm:$0xff] }
0x1037   :  { %2282 = vmatmul.mubr.msk.f32.vlgmr.msra.gmra.mxu0 %vm125_vm1, %v969_v25  ;;  %2315 = vmatprep.subr.mxu0 %v2527_v0 }
0x1038   :  { %2284 = vmatprep.mubr.msk.f32.mxu0 %vm125_vm1, %v970_v26  ;;  %2316 = vmatpush3.msra.mxu0 %v2800_v47 }
0x1039   :  { %2317 = vmatprep.subr.mxu0 %v2527_v0 }
0x103a   :  { %2318 = vmatpush3.msra.mxu0 %v2806_v48 }
0x103b   :  { %2285 = vmatmul.mubr.msk.f32.gmra.mxu0 %vm125_vm1, %v971_v27  ;;  %2319 = vmatprep.subr.mxu0 %v2527_v0 }
0x103c   :  { %2287 = vmatprep.mubr.msk.f32.mxu0 %vm125_vm1, %v972_v28  ;;  %2320 = vmatpush3.msra.mxu0 %v2813_v49 }
0x103d   :  { %2321 = vmatprep.subr.mxu0 %v2527_v0 }
0x103e   :  { %2322 = vmatpush3.msra.mxu0 %v2820_v50 }
0x103f   :  { %2288 = vmatmul.mubr.msk.f32.gmra.mxu0 %vm125_vm1, %v973_v29  ;;  %2337 = vmatprep.subr.mxu0 %v2527_v0 }
0x10ef   :  { %v828_v33 = vpop.f32.mrf.mxu0 }
0x10f0   :  { %v832_v34 = vadd.f32 %v828_v33, %v108_v32 }
0x10f1   :  { %v2261_v35 = vpop.f32.mrf.mxu0 }
0x10f2   :  { %2447 = vtanh.f32 %v832_v34  ;;  %v2051_v37 = vmul.f32 -1.442695, %v832_v34 }
0x10f4   :  { %2449 = vpow2.f32 %v2051_v37 }
0x10f7   :  { %v2857_v57 = vpop.f32.mrf.mxu0 }
0x10f8   :  { %v1084_v34 = vadd.f32 %v2857_v57, %v2862_v1 }
0x10f9   :  { %v1078_v60 = vpop.f32.mrf.mxu0 }
0x10fa   :  { %v1079_v61 = vadd.f32 %v2862_v1, %v1078_v60 }
0x10fb   :  { %v2286_v60 = vpop.f32.mrf.mxu0 }
0x10ff   :  { %v2448_v36 = vpop.eup %2447 }
0x1100   :  { %842 = vrot.lane.b32.xlu0 %v2448_v36, %s2531_s28 }
0x1101   :  { %v2450_v38 = vpop.eup %2449 }
0x1102   :  { %v836_v39 = vadd.f32 1.0, %v2450_v38 }
0x1104   :  { %2451 = vrcp.f32 %v836_v39 }
0x1111   :  { %v2452_v40 = vpop.eup %2451 }
0x1112   :  { %v840_v43 = vmul.f32 %v2452_v40, %v745_v14 }
0x1172   :  { %v843_v41 = vpop.permute.xlu0 %842 }
0x1173   :  { %v845_v42 = vmul.f32 %v2452_v40, %v843_v41 }
0x1175   :  { %847 = vrot.lane.b32.xlu1 %v845_v42, %s2530_s21 }
0x11e7   :  { %v848_v44 = vpop.permute.xlu1 %847 }
0x11e8   :  { %v2793_v45 = vadd.f32 %v848_v44, %v840_v43 }
0x11ea   :  { %2453 = vtanh.f32 %v2793_v45 }
0x11f7   :  { %v2454_v46 = vpop.eup %2453 }
0x11f8   :  { %853 = vrot.lane.b32.xlu0 %v2454_v46, %s2531_s28 }
0x126a   :  { %v854_v51 = vpop.permute.xlu0 %853 }
0x126b   :  { %v856_v52 = vmul.f32 %v2452_v40, %v854_v51 }
0x126d   :  { %858 = vrot.lane.b32.xlu1 %v856_v52, %s2530_s21 }
0x1271   :  { %1217 = vrot.lane.b32.xlu1 %v2069_v53, %s2530_s21 }
0x12df   :  { %v859_v54 = vpop.permute.xlu1 %858 }
0x12e0   :  { %862 = vst.msk [vmem:[#allocation2 + $0x30] sm:$0xff] %vm125_vm1, %v859_v54  ;;  %2271 = vmatmul.mubr.msk.f32.vlgmr.msra.gmra.mxu1 %vm125_vm1, %v859_v54 }
0x12e1   :  { %2294 = vmatpush3.msra.mxu1 %v2800_v47  ;;  %2301 = vmatprep.mubr.msk.f32.mxu1 %vm2528_vm0, %v2527_v0 }
0x12e2   :  { %2295 = vmatprep.subr.mxu1 %v2527_v0 }
0x12e3   :  { %2296 = vmatpush3.msra.mxu1 %v2806_v48  ;;  %v1218_v11 = vpop.permute.xlu1 %1217 }
0x12e4   :  { %2297 = vmatprep.subr.mxu1 %v2527_v0 }
0x12e5   :  { %2298 = vmatpush3.msra.mxu1 %v2813_v49 }
0x12e6   :  { %2299 = vmatprep.subr.mxu1 %v2527_v0 }
0x12e7   :  { %2300 = vmatpush3.msra.mxu1 %v2820_v50  ;;  %v974_v56 = vld [vmem:[#allocation2 + $0x30] sm:$0xff] }
0x12e8   :  { %2302 = vmatmul.mubr.msk.f32.vlgmr.msra.gmra.mxu1 %vm125_vm1, %v2068_v55  ;;  %2290 = vmatprep.mubr.msk.f32.mxu0 %vm125_vm1, %v974_v56 }
0x12e9   :  { %2304 = vmatprep.subr.mxu1 %v2527_v0  ;;  %2312 = vmatprep.mubr.msk.f32.mxu1 %vm2528_vm0, %v2527_v0 }
0x12ea   :  { %2305 = vmatpush3.msra.mxu1 %v2800_v47 }
0x12eb   :  { %2306 = vmatprep.subr.mxu1 %v2527_v0 }
0x12ec   :  { %2307 = vmatpush3.msra.mxu1 %v2806_v48 }
0x12ed   :  { %2308 = vmatprep.subr.mxu1 %v2527_v0 }
0x12ee   :  { %2309 = vmatpush3.msra.mxu1 %v2813_v49 }
0x12ef   :  { %2310 = vmatprep.subr.mxu1 %v2527_v0 }
0x12f0   :  { %2311 = vmatpush3.msra.mxu1 %v2820_v50 }
0x12f1   :  { %2326 = vmatprep.subr.mxu1 %v2527_v0 }
0x13a0   :  { %v933_v58 = vpop.f32.mrf.mxu1 }
0x13a2   :  { %v2272_v59 = vpop.f32.mrf.mxu1 }
0x13a8   :  { %v1204_v62 = vpop.f32.mrf.mxu1 }
0x13a9   :  { %v1208_v63 = vadd.f32 %v1204_v62, %v1079_v61  ;;  %v1088_v61 = vpop.f32.mrf.mxu0 }
0x13aa   :  { %v2303_v3 = vpop.f32.mrf.mxu1 }
0x13ab   :  { %2455 = vtanh.f32 %v1208_v63  ;;  %v2071_v5 = vmul.f32 -1.442695, %v1208_v63  ;;  %v2915_v62 = vpop.f32.mrf.mxu0 }
0x13ad   :  { %2457 = vpow2.f32 %v2071_v5  ;;  %v2917_v63 = vpop.f32.mrf.mxu0  ;;  %v1089_v5 = vadd.f32 %v2862_v1, %v1088_v61 }
0x13b8   :  { %v2456_v2 = vpop.eup %2455 }
0x13b9   :  { %1222 = vrot.lane.b32.xlu0 %v2456_v2, %s2531_s28 }
0x13ba   :  { %v2458_v4 = vpop.eup %2457 }
0x13bb   :  { %v1212_v6 = vadd.f32 1.0, %v2458_v4 }
0x13bd   :  { %2459 = vrcp.f32 %v1212_v6 }
0x13ca   :  { %v2460_v7 = vpop.eup %2459 }
0x13cb   :  { %v1220_v13 = vmul.f32 %v2460_v7, %v1218_v11 }
0x142b   :  { %v1223_v8 = vpop.permute.xlu0 %1222 }
0x142c   :  { %v1225_v10 = vmul.f32 %v2460_v7, %v1223_v8 }
0x142e   :  { %1227 = vrot.lane.b32.xlu0 %v1225_v10, %s2530_s21 }
0x14a0   :  { %v1228_v14 = vpop.permute.xlu0 %1227 }
0x14a1   :  { %v2867_v15 = vadd.f32 %v1228_v14, %v1220_v13 }
0x14a3   :  { %2461 = vtanh.f32 %v2867_v15 }
0x14b0   :  { %v2462_v16 = vpop.eup %2461 }
0x14b1   :  { %1233 = vrot.lane.b32.xlu1 %v2462_v16, %s2531_s28 }
0x14b5   :  { %78 = vperm.xlu1 %2398, %v39_v17  }
0x1523   :  { %v1234_v18 = vpop.permute.xlu1 %1233 }
0x1524   :  { %v1236_v19 = vmul.f32 %v2460_v7, %v1234_v18 }
0x1526   :  { %1239 = vrot.lane.b32.xlu0 %v1236_v19, %s2530_s21 }
0x1530   :  { %v79_v20 = vpop.permute.xlu1 %78 }
0x1531   :  { %v94_v21 = vmul.f32 %v2648_v9, %v79_v20 }
0x1533   :  { %v109_v22 = vadd.f32 %v2654_v12, %v94_v21 }
0x1535   :  { %v937_v23 = vadd.f32 %v933_v58, %v109_v22 }
0x1537   :  { %2463 = vtanh.f32 %v937_v23  ;;  %v2053_v25 = vmul.f32 -1.442695, %v937_v23 }
0x1539   :  { %2465 = vpow2.f32 %v2053_v25 }
0x1544   :  { %v2464_v24 = vpop.eup %2463 }
0x1545   :  { %947 = vrot.lane.b32.xlu0 %v2464_v24, %s2531_s28  ;;  %v1094_v24 = vadd.f32 %v2286_v60, %v2862_v1 }
0x1546   :  { %v2466_v9 = vpop.eup %2465 }
0x1547   :  { %v941_v12 = vadd.f32 1.0, %v2466_v9 }
0x1549   :  { %2467 = vrcp.f32 %v941_v12 }
0x1556   :  { %v2468_v27 = vpop.eup %2467 }
0x1557   :  { %v945_v30 = vmul.f32 %v2468_v27, %v2793_v45 }
0x1598   :  { %v1240_v26 = vpop.permute.xlu0 %1239 }
0x1599   :  { %2313 = vmatmul.mubr.msk.f32.vlgmr.msra.gmra.mxu1 %vm125_vm1, %v1240_v26 }
0x159a   :  { %2327 = vmatpush3.msra.mxu1 %v2800_v47  ;;  %2334 = vmatprep.mubr.msk.f32.mxu1 %vm2528_vm0, %v2527_v0 }
0x159b   :  { %2328 = vmatprep.subr.mxu1 %v2527_v0 }
0x159c   :  { %2329 = vmatpush3.msra.mxu1 %v2806_v48 }
0x159d   :  { %2330 = vmatprep.subr.mxu1 %v2527_v0 }
0x159e   :  { %2331 = vmatpush3.msra.mxu1 %v2813_v49 }
0x159f   :  { %2332 = vmatprep.subr.mxu1 %v2527_v0 }
0x15a0   :  { %2333 = vmatpush3.msra.mxu1 %v2820_v50 }
0x15a1   :  { %2348 = vmatprep.subr.mxu1 %v2527_v0 }
0x15b7   :  { %v948_v28 = vpop.permute.xlu0 %947 }
0x15b8   :  { %v950_v29 = vmul.f32 %v2468_v27, %v948_v28 }
0x15ba   :  { %952 = vrot.lane.b32.xlu0 %v950_v29, %s2530_s21 }
0x162c   :  { %v953_v31 = vpop.permute.xlu0 %952 }
0x162d   :  { %v955_v32 = vadd.f32 %v953_v31, %v945_v30 }
0x162f   :  { %2469 = vtanh.f32 %v955_v32 }
0x163c   :  { %v2470_v33 = vpop.eup %2469 }
0x163d   :  { %958 = vrot.lane.b32.xlu0 %v2470_v33, %s2531_s28 }
0x1659   :  { %v1309_v35 = vpop.f32.mrf.mxu1 }
0x165a   :  { %v1313_v36 = vadd.f32 %v1309_v35, %v1084_v34 }
0x165b   :  { %v2314_v37 = vpop.f32.mrf.mxu1 }
0x165c   :  { %2471 = vtanh.f32 %v1313_v36  ;;  %v2073_v41 = vmul.f32 -1.442695, %v1313_v36 }
0x165e   :  { %2473 = vpow2.f32 %v2073_v41 }
0x1669   :  { %v2472_v38 = vpop.eup %2471 }
0x166a   :  { %1323 = vrot.lane.b32.xlu1 %v2472_v38, %s2531_s28 }
0x166b   :  { %v2474_v42 = vpop.eup %2473 }
0x166c   :  { %v1317_v43 = vadd.f32 1.0, %v2474_v42 }
0x166e   :  { %2475 = vrcp.f32 %v1317_v43 }
0x167b   :  { %v2476_v44 = vpop.eup %2475 }
0x167c   :  { %v1321_v53 = vmul.f32 %v2476_v44, %v2867_v15 }
0x16af   :  { %v959_v39 = vpop.permute.xlu0 %958 }
0x16b0   :  { %v961_v40 = vmul.f32 %v2468_v27, %v959_v39 }
0x16b2   :  { %963 = vrot.lane.b32.xlu0 %v961_v40, %s2530_s21  ;;  %v1099_v40 = vadd.f32 %v2862_v1, %v2917_v63  ;;  %v1104_v63 = vadd.f32 %v2915_v62, %v2862_v1 }
0x16dc   :  { %v1324_v45 = vpop.permute.xlu1 %1323 }
0x16dd   :  { %v1326_v46 = vmul.f32 %v2476_v44, %v1324_v45 }
0x16df   :  { %1328 = vrot.lane.b32.xlu1 %v1326_v46, %s2530_s21 }
0x1724   :  { %v964_v51 = vpop.permute.xlu0 %963 }
0x1725   :  { %967 = vst.msk [vmem:[#allocation2 + $0x38] sm:$0xff] %vm125_vm1, %v964_v51 }
0x172c   :  { %v975_v52 = vld [vmem:[#allocation2 + $0x38] sm:$0xff] }
0x172d   :  { %2291 = vmatmul.mubr.msk.f32.gmra.mxu0 %vm125_vm1, %v975_v52 }
0x172e   :  { %2323 = vmatprep.mubr.msk.f32.mxu0 %vm2528_vm0, %v2527_v0 }
0x1751   :  { %v1329_v54 = vpop.permute.xlu1 %1328 }
0x1752   :  { %v1331_v55 = vadd.f32 %v1329_v54, %v1321_v53 }
0x1754   :  { %2477 = vtanh.f32 %v1331_v55 }
0x1761   :  { %v2478_v56 = vpop.eup %2477 }
0x1762   :  { %1334 = vrot.lane.b32.xlu1 %v2478_v56, %s2531_s28 }
0x17d4   :  { %v1335_v57 = vpop.permute.xlu1 %1334 }
0x17d5   :  { %v1337_v58 = vmul.f32 %v2476_v44, %v1335_v57 }
0x17d7   :  { %1340 = vrot.lane.b32.xlu1 %v1337_v58, %s2530_s21 }
0x17ed   :  { %v2919_v3 = vpop.f32.mrf.mxu0 }
0x17ef   :  { %v2921_v2 = vpop.f32.mrf.mxu0 }
0x1849   :  { %v1341_v59 = vpop.permute.xlu1 %1340 }
0x184a   :  { %2324 = vmatmul.mubr.msk.f32.vlgmr.msra.gmra.mxu0 %vm125_vm1, %v1341_v59 }
0x184b   :  { %2338 = vmatpush3.msra.mxu0 %v2800_v47  ;;  %2345 = vmatprep.mubr.msk.f32.mxu0 %vm2528_vm0, %v2527_v0 }
0x184c   :  { %2339 = vmatprep.subr.mxu0 %v2527_v0 }
0x184d   :  { %2340 = vmatpush3.msra.mxu0 %v2806_v48 }
0x184e   :  { %2341 = vmatprep.subr.mxu0 %v2527_v0 }
0x184f   :  { %2342 = vmatpush3.msra.mxu0 %v2813_v49 }
0x1850   :  { %2343 = vmatprep.subr.mxu0 %v2527_v0 }
0x1851   :  { %2344 = vmatpush3.msra.mxu0 %v2820_v50 }
0x1852   :  { %2359 = vmatprep.subr.mxu0 %v2527_v0 }
0x190a   :  { %v1410_v4 = vpop.f32.mrf.mxu0 }
0x190b   :  { %v1414_v6 = vadd.f32 %v1410_v4, %v1089_v5 }
0x190c   :  { %v2325_v7 = vpop.f32.mrf.mxu0 }
0x190d   :  { %2479 = vtanh.f32 %v1414_v6  ;;  %v2075_v10 = vmul.f32 -1.442695, %v1414_v6 }
0x190f   :  { %2481 = vpow2.f32 %v2075_v10 }
0x191a   :  { %v2480_v8 = vpop.eup %2479 }
0x191b   :  { %1424 = vrot.lane.b32.xlu0 %v2480_v8, %s2531_s28 }
0x191c   :  { %v2482_v11 = vpop.eup %2481 }
0x191d   :  { %v1418_v13 = vadd.f32 1.0, %v2482_v11 }
0x191f   :  { %2483 = vrcp.f32 %v1418_v13 }
0x192c   :  { %v2484_v14 = vpop.eup %2483 }
0x192d   :  { %v1422_v17 = vmul.f32 %v2484_v14, %v1331_v55 }
0x198d   :  { %v1425_v15 = vpop.permute.xlu0 %1424 }
0x198e   :  { %v1427_v16 = vmul.f32 %v2484_v14, %v1425_v15 }
0x1990   :  { %1429 = vrot.lane.b32.xlu1 %v1427_v16, %s2530_s21 }
0x1a02   :  { %v1430_v18 = vpop.permute.xlu1 %1429 }
0x1a03   :  { %v1432_v19 = vadd.f32 %v1430_v18, %v1422_v17  ;;  %v1109_v18 = vadd.f32 %v2862_v1, %v2921_v2 }
0x1a05   :  { %2485 = vtanh.f32 %v1432_v19 }
0x1a12   :  { %v2486_v20 = vpop.eup %2485 }
0x1a13   :  { %1435 = vrot.lane.b32.xlu0 %v2486_v20, %s2531_s28 }
0x1a85   :  { %v1436_v21 = vpop.permute.xlu0 %1435 }
0x1a86   :  { %v1438_v22 = vmul.f32 %v2484_v14, %v1436_v21 }
0x1a88   :  { %1441 = vrot.lane.b32.xlu1 %v1438_v22, %s2530_s21 }
0x1afa   :  { %v1442_v23 = vpop.permute.xlu1 %1441 }
0x1afb   :  { %2335 = vmatmul.mubr.msk.f32.vlgmr.msra.gmra.mxu1 %vm125_vm1, %v1442_v23 }
0x1afc   :  { %2349 = vmatpush3.msra.mxu1 %v2800_v47  ;;  %2356 = vmatprep.mubr.msk.f32.mxu1 %vm2528_vm0, %v2527_v0 }
0x1afd   :  { %2350 = vmatprep.subr.mxu1 %v2527_v0 }
0x1afe   :  { %2351 = vmatpush3.msra.mxu1 %v2806_v48 }
0x1aff   :  { %2352 = vmatprep.subr.mxu1 %v2527_v0 }
0x1b00   :  { %2353 = vmatpush3.msra.mxu1 %v2813_v49 }
0x1b01   :  { %2354 = vmatprep.subr.mxu1 %v2527_v0 }
0x1b02   :  { %2355 = vmatpush3.msra.mxu1 %v2820_v50 }
0x1b03   :  { %2370 = vmatprep.subr.mxu1 %v2527_v0 }
0x1bbb   :  { %v1511_v25 = vpop.f32.mrf.mxu1 }
0x1bbc   :  { %v1515_v26 = vadd.f32 %v1511_v25, %v1094_v24 }
0x1bbd   :  { %v2336_v9 = vpop.f32.mrf.mxu1 }
0x1bbe   :  { %2487 = vtanh.f32 %v1515_v26  ;;  %v2077_v27 = vmul.f32 -1.442695, %v1515_v26 }
0x1bc0   :  { %2489 = vpow2.f32 %v2077_v27 }
0x1bcb   :  { %v2488_v12 = vpop.eup %2487 }
0x1bcc   :  { %1525 = vrot.lane.b32.xlu0 %v2488_v12, %s2531_s28 }
0x1bcd   :  { %v2490_v28 = vpop.eup %2489 }
0x1bce   :  { %v1519_v29 = vadd.f32 1.0, %v2490_v28 }
0x1bd0   :  { %2491 = vrcp.f32 %v1519_v29 }
0x1bdd   :  { %v2492_v30 = vpop.eup %2491 }
0x1bde   :  { %v1523_v33 = vmul.f32 %v2492_v30, %v1432_v19 }
0x1c3e   :  { %v1526_v31 = vpop.permute.xlu0 %1525 }
0x1c3f   :  { %v1528_v32 = vmul.f32 %v2492_v30, %v1526_v31 }
0x1c41   :  { %1530 = vrot.lane.b32.xlu1 %v1528_v32, %s2530_s21 }
0x1cb3   :  { %v1531_v34 = vpop.permute.xlu1 %1530 }
0x1cb4   :  { %v1533_v35 = vadd.f32 %v1531_v34, %v1523_v33  ;;  %v1114_v33 = vadd.f32 %v2919_v3, %v2862_v1  ;;  %v1947_v3 = vld [vmem:[%s3022_s7 + $0x18] sm:$0xff] }
0x1cb6   :  { %2493 = vtanh.f32 %v1533_v35 }
0x1cc3   :  { %v2494_v36 = vpop.eup %2493 }
0x1cc4   :  { %1536 = vrot.lane.b32.xlu0 %v2494_v36, %s2531_s28 }
0x1d36   :  { %v1537_v37 = vpop.permute.xlu0 %1536 }
0x1d37   :  { %v1539_v38 = vmul.f32 %v2492_v30, %v1537_v37 }
0x1d39   :  { %1542 = vrot.lane.b32.xlu1 %v1539_v38, %s2530_s21 }
0x1dab   :  { %v1543_v39 = vpop.permute.xlu1 %1542 }
0x1dac   :  { %2346 = vmatmul.mubr.msk.f32.vlgmr.msra.gmra.mxu0 %vm125_vm1, %v1543_v39 }
0x1dad   :  { %2360 = vmatpush3.msra.mxu0 %v2800_v47  ;;  %2367 = vmatprep.mubr.msk.f32.mxu0 %vm2528_vm0, %v2527_v0 }
0x1dae   :  { %2361 = vmatprep.subr.mxu0 %v2527_v0 }
0x1daf   :  { %2362 = vmatpush3.msra.mxu0 %v2806_v48 }
0x1db0   :  { %2363 = vmatprep.subr.mxu0 %v2527_v0 }
0x1db1   :  { %2364 = vmatpush3.msra.mxu0 %v2813_v49 }
0x1db2   :  { %2365 = vmatprep.subr.mxu0 %v2527_v0 }
0x1db3   :  { %2366 = vmatpush3.msra.mxu0 %v2820_v50 }
0x1db4   :  { %2381 = vmatprep.subr.mxu0 %v2527_v0 }
0x1e6c   :  { %v1612_v41 = vpop.f32.mrf.mxu0 }
0x1e6d   :  { %v1616_v42 = vadd.f32 %v1612_v41, %v1099_v40 }
0x1e6e   :  { %v2347_v43 = vpop.f32.mrf.mxu0 }
0x1e6f   :  { %2495 = vtanh.f32 %v1616_v42  ;;  %v2079_v45 = vmul.f32 -1.442695, %v1616_v42 }
0x1e71   :  { %2497 = vpow2.f32 %v2079_v45 }
0x1e7c   :  { %v2496_v44 = vpop.eup %2495 }
0x1e7d   :  { %1626 = vrot.lane.b32.xlu0 %v2496_v44, %s2531_s28 }
0x1e7e   :  { %v2498_v46 = vpop.eup %2497 }
0x1e7f   :  { %v1620_v51 = vadd.f32 1.0, %v2498_v46  ;;  %v1946_v46 = vld [vmem:[%s3022_s7 + $0x10] sm:$0xff] }
0x1e81   :  { %2499 = vrcp.f32 %v1620_v51  ;;  %v1945_v51 = vld [vmem:[%s3022_s7 + $0x8] sm:$0xff] }
0x1e8e   :  { %v2500_v52 = vpop.eup %2499 }
0x1e8f   :  { %v1624_v55 = vmul.f32 %v2500_v52, %v1533_v35 }
0x1eef   :  { %v1627_v53 = vpop.permute.xlu0 %1626 }
0x1ef0   :  { %v1629_v54 = vmul.f32 %v2500_v52, %v1627_v53 }
0x1ef2   :  { %1631 = vrot.lane.b32.xlu1 %v1629_v54, %s2530_s21 }
0x1f64   :  { %v1632_v56 = vpop.permute.xlu1 %1631 }
0x1f65   :  { %v1634_v57 = vadd.f32 %v1632_v56, %v1624_v55 }
0x1f67   :  { %2501 = vtanh.f32 %v1634_v57 }
0x1f74   :  { %v2502_v58 = vpop.eup %2501 }
0x1f75   :  { %1637 = vrot.lane.b32.xlu0 %v2502_v58, %s2531_s28 }
0x1fe7   :  { %v1638_v59 = vpop.permute.xlu0 %1637 }
0x1fe8   :  { %v1640_v60 = vmul.f32 %v2500_v52, %v1638_v59  ;;  %v1944_v52 = vld [vmem:[%s3022_s7] sm:$0xff] }
0x1fea   :  { %1643 = vrot.lane.b32.xlu1 %v1640_v60, %s2530_s21 }
0x205c   :  { %v1644_v61 = vpop.permute.xlu1 %1643 }
0x205d   :  { %2357 = vmatmul.mubr.msk.f32.vlgmr.msra.gmra.mxu1 %vm125_vm1, %v1644_v61 }
0x205e   :  { %2371 = vmatpush3.msra.mxu1 %v2800_v47  ;;  %2378 = vmatprep.mubr.msk.f32.mxu1 %vm2528_vm0, %v2527_v0 }
0x205f   :  { %2372 = vmatprep.subr.mxu1 %v2527_v0 }
0x2060   :  { %2373 = vmatpush3.msra.mxu1 %v2806_v48 }
0x2061   :  { %2374 = vmatprep.subr.mxu1 %v2527_v0 }
0x2062   :  { %2375 = vmatpush3.msra.mxu1 %v2813_v49 }
0x2063   :  { %2376 = vmatprep.subr.mxu1 %v2527_v0 }
0x2064   :  { %2377 = vmatpush3.msra.mxu1 %v2820_v50 }
0x211d   :  { %v1713_v5 = vpop.f32.mrf.mxu1 }
0x211e   :  { %v1717_v47 = vadd.f32 %v1713_v5, %v1104_v63 }
0x211f   :  { %v2358_v4 = vpop.f32.mrf.mxu1 }
0x2120   :  { %2503 = vtanh.f32 %v1717_v47  ;;  %v2081_v7 = vmul.f32 -1.442695, %v1717_v47 }
0x2122   :  { %2505 = vpow2.f32 %v2081_v7 }
0x212d   :  { %v2504_v6 = vpop.eup %2503 }
0x212e   :  { %1727 = vrot.lane.b32.xlu0 %v2504_v6, %s2531_s28 }
0x212f   :  { %v2506_v48 = vpop.eup %2505 }
0x2130   :  { %v1721_v8 = vadd.f32 1.0, %v2506_v48 }
0x2132   :  { %2507 = vrcp.f32 %v1721_v8 }
0x213f   :  { %v2508_v49 = vpop.eup %2507 }
0x2140   :  { %v1725_v50 = vmul.f32 %v2508_v49, %v1634_v57  ;;  %v2086_v57 = vld [vmem:[%s3023_s8] ss:$0 sm:$0xff] }
0x21a0   :  { %v1728_v10 = vpop.permute.xlu0 %1727 }
0x21a1   :  { %v1730_v11 = vmul.f32 %v2508_v49, %v1728_v10 }
0x21a3   :  { %1732 = vrot.lane.b32.xlu1 %v1730_v11, %s2530_s21 }
0x2215   :  { %v1733_v13 = vpop.permute.xlu1 %1732 }
0x2216   :  { %v1735_v62 = vadd.f32 %v1733_v13, %v1725_v50 }
0x2218   :  { %2509 = vtanh.f32 %v1735_v62 }
0x2225   :  { %v2510_v14 = vpop.eup %2509 }
0x2226   :  { %1738 = vrot.lane.b32.xlu0 %v2510_v14, %s2531_s28 }
0x2298   :  { %v1739_v15 = vpop.permute.xlu0 %1738 }
0x2299   :  { %v1741_v16 = vmul.f32 %v2508_v49, %v1739_v15 }
0x229b   :  { %1744 = vrot.lane.b32.xlu1 %v1741_v16, %s2530_s21 }
0x230d   :  { %v1745_v17 = vpop.permute.xlu1 %1744 }
0x230e   :  { %2368 = vmatmul.mubr.msk.f32.vlgmr.msra.gmra.mxu0 %vm125_vm1, %v1745_v17 }
0x230f   :  { %2389 = vmatprep.mubr.msk.f32.mxu0 %vm2528_vm0, %v2527_v0  ;;  %2382 = vmatpush3.msra.mxu0 %v1947_v3 }
0x2310   :  { %2383 = vmatprep.subr.mxu0 %v2527_v0 }
0x2311   :  { %2384 = vmatpush3.msra.mxu0 %v1946_v46 }
0x2312   :  { %2385 = vmatprep.subr.mxu0 %v2527_v0 }
0x2313   :  { %2386 = vmatpush3.msra.mxu0 %v1945_v51 }
0x2314   :  { %2387 = vmatprep.subr.mxu0 %v2527_v0 }
0x2315   :  { %2388 = vmatpush3.msra.mxu0 %v1944_v52 }
0x23ce   :  { %v1814_v19 = vpop.f32.mrf.mxu0 }
0x23cf   :  { %v1818_v20 = vadd.f32 %v1814_v19, %v1109_v18 }
0x23d0   :  { %v2369_v21 = vpop.f32.mrf.mxu0 }
0x23d1   :  { %2511 = vtanh.f32 %v1818_v20  ;;  %v2083_v23 = vmul.f32 -1.442695, %v1818_v20 }
0x23d3   :  { %2513 = vpow2.f32 %v2083_v23 }
0x23de   :  { %v2512_v22 = vpop.eup %2511 }
0x23df   :  { %1828 = vrot.lane.b32.xlu0 %v2512_v22, %s2531_s28 }
0x23e0   :  { %v2514_v24 = vpop.eup %2513 }
0x23e1   :  { %v1822_v25 = vadd.f32 1.0, %v2514_v24 }
0x23e3   :  { %2515 = vrcp.f32 %v1822_v25 }
0x23f0   :  { %v2516_v26 = vpop.eup %2515 }
0x23f1   :  { %v1826_v27 = vmul.f32 %v2516_v26, %v1735_v62 }
0x2451   :  { %v1829_v9 = vpop.permute.xlu0 %1828 }
0x2452   :  { %v1831_v12 = vmul.f32 %v2516_v26, %v1829_v9 }
0x2454   :  { %1833 = vrot.lane.b32.xlu1 %v1831_v12, %s2530_s21 }
0x24c6   :  { %v1834_v28 = vpop.permute.xlu1 %1833 }
0x24c7   :  { %v1836_v2 = vadd.f32 %v1834_v28, %v1826_v27 }
0x24c9   :  { %2517 = vtanh.f32 %v1836_v2 }
0x24d6   :  { %v2518_v29 = vpop.eup %2517 }
0x24d7   :  { %1839 = vrot.lane.b32.xlu0 %v2518_v29, %s2531_s28 }
0x2549   :  { %v1840_v30 = vpop.permute.xlu0 %1839 }
0x254a   :  { %v1842_v31 = vmul.f32 %v2516_v26, %v1840_v30 }
0x254c   :  { %1845 = vrot.lane.b32.xlu1 %v1842_v31, %s2530_s21 }
0x25be   :  { %v1846_v32 = vpop.permute.xlu1 %1845 }
0x25bf   :  { %2379 = vmatmul.mubr.msk.f32.vlgmr.msra.gmra.mxu1 %vm125_vm1, %v1846_v32 }
0x267f   :  { %v1915_v34 = vpop.f32.mrf.mxu1 }
0x2680   :  { %v1919_v35 = vadd.f32 %v1915_v34, %v1114_v33 }
0x2681   :  { %v2380_v36 = vpop.f32.mrf.mxu1 }
0x2682   :  { %2519 = vtanh.f32 %v1919_v35  ;;  %v2085_v38 = vmul.f32 -1.442695, %v1919_v35 }
0x2684   :  { %2521 = vpow2.f32 %v2085_v38 }
0x268f   :  { %v2520_v37 = vpop.eup %2519 }
0x2690   :  { %1929 = vrot.lane.b32.xlu0 %v2520_v37, %s2531_s28 }
0x2691   :  { %v2522_v39 = vpop.eup %2521 }
0x2692   :  { %v1923_v40 = vadd.f32 1.0, %v2522_v39 }
0x2694   :  { %2523 = vrcp.f32 %v1923_v40 }
0x26a1   :  { %v2524_v41 = vpop.eup %2523 }
0x26a2   :  { %v1927_v44 = vmul.f32 %v2524_v41, %v1836_v2 }
0x2702   :  { %v1930_v42 = vpop.permute.xlu0 %1929 }
0x2703   :  { %v1932_v43 = vmul.f32 %v2524_v41, %v1930_v42 }
0x2705   :  { %1934 = vrot.lane.b32.xlu1 %v1932_v43, %s2530_s21 }
0x2777   :  { %v1935_v45 = vpop.permute.xlu1 %1934 }
0x2778   :  { %v1937_v1 = vadd.f32 %v1935_v45, %v1927_v44 }
0x277a   :  { %2525 = vtanh.f32 %v1937_v1 }
0x2787   :  { %v2526_v53 = vpop.eup %2525 }
0x2788   :  { %1940 = vrot.lane.b32.xlu0 %v2526_v53, %s2531_s28 }
0x27fa   :  { %v1941_v54 = vpop.permute.xlu0 %1940 }
0x27fb   :  { %v1943_v55 = vmul.f32 %v2524_v41, %v1941_v54 }
0x27fd   :  { %1956 = vrot.lane.b32.xlu1 %v1943_v55, %s2530_s21 }
0x286f   :  { %v1957_v56 = vpop.permute.xlu1 %1956 }
0x2870   :  { %2390 = vmatmul.mubr.msk.f32.vlgmr.msra.gmra.mxu0 %vm125_vm1, %v1957_v56 }
0x2930   :  { %v2026_v58 = vpop.f32.mrf.mxu0 }
0x2931   :  { %v2027_v59 = vadd.f32 %v2086_v57, %v2026_v58 }
0x2932   :  { %v2391_v60 = vpop.f32.mrf.mxu0 }
0x2933   :  { %2031 = vst.msk [vmem:[%s3024_s9] sm:$0xff] %vm2030_vm2, %v2027_v59 }

</bundles_post_ra>
